<compile_context>
chip_gen: v6e
topology: v6e:2x2x1
jax: 0.10.0
libtpu: 0.0.40
codegen_flags: <defaults>
</compile_context>

<pallas_src>
import jax
import jax.numpy as jnp
from jax.experimental import pallas as pl
from jax.experimental.pallas import tpu as pltpu


def _kconv_bnr_kernel(x9_ref, w3_ref, bn_ref, o_ref):
    """One (batch, hw_tile) grid step.

    x9_ref : (1, T, 9*Cp) bf16  -- 9 shifted taps concatenated on channels
    w3_ref : (9*Cp, Cp)   bf16  -- fused 3x3 conv weights (rows: kh, kw, cin)
    bn_ref : (8, Cp)      f32   -- row 0 = folded BN scale, row 1 = folded BN shift
    o_ref  : (1, T, Cp)   f32
    """
    # Single fused MXU matmul (K = 9*Cp), f32 accumulation.
    acc = jnp.dot(x9_ref[0], w3_ref[...], preferred_element_type=jnp.float32)

    # Eval-mode BatchNorm (folded) + ReLU, all in float32.
    bn = bn_ref[...]
    scale = bn[0:1, :]
    shift = bn[1:2, :]
    o_ref[0] = jnp.maximum(acc * scale + shift, 0.0).astype(o_ref.dtype)


def _pick_hw_tile(hw, max_tile=1024):
    """Largest divisor of hw that is a multiple of 8 and <= max_tile (or hw itself)."""
    if hw <= max_tile:
        return hw
    for t in range(max_tile - max_tile % 8, 7, -8):
        if hw % t == 0:
            return t
    return hw  # fall back to a single full-extent block


def kconv_bnr(x_nchw, w3_hwio, bn_gamma, bn_beta, bn_mean, bn_var, eps=1e-5):
    """x_nchw: (N, C, H, W) float32. Returns (N, C, H, W) float32."""
    x = jnp.transpose(x_nchw, (0, 2, 3, 1)).astype(jnp.float32)   # NHWC
    n, h, w, c = x.shape
    hw = h * w
    cp = ((c + 127) // 128) * 128        # lane-dense channel count
    tile = _pick_hw_tile(hw)

    # --- im2col-lite: pad channels (zeros contribute nothing), zero-pad spatially,
    #     concatenate the 9 shifted views on the channel axis -> (N, HW, 9*Cp) bf16.
    xc = jnp.pad(x, ((0, 0), (0, 0), (0, 0), (0, cp - c)))
    xpad = jnp.pad(xc, ((0, 0), (1, 1), (1, 1), (0, 0)))
    taps = [xpad[:, dh:dh + h, dw:dw + w, :] for dh in range(3) for dw in range(3)]
    x9 = jnp.concatenate(taps, axis=-1).reshape(n, hw, 9 * cp).astype(jnp.bfloat16)

    # --- fused conv weights: HWIO -> (9*Cp, Cp), rows grouped (kh, kw, cin)
    #     to match the tap concatenation order above.
    w3 = jnp.pad(w3_hwio.astype(jnp.float32),
                 ((0, 0), (0, 0), (0, cp - c), (0, cp - c)))
    w3 = w3.reshape(9 * cp, cp).astype(jnp.bfloat16)

    # --- fold eval-mode BatchNorm into scale/shift, packed into one (8, Cp) slab.
    scale = (bn_gamma / jnp.sqrt(bn_var + eps)).astype(jnp.float32)
    shift = (bn_beta.astype(jnp.float32) - bn_mean.astype(jnp.float32) * scale)
    bn = jnp.zeros((8, cp), jnp.float32)
    bn = bn.at[0, :c].set(scale)
    bn = bn.at[1, :c].set(shift)

    grid = (n, hw // tile)
    cost = pl.CostEstimate(
        flops=2 * n * hw * (9 * cp) * cp,
        transcendentals=0,
        bytes_accessed=x9.size * 2 + w3.size * 2 + bn.size * 4 + n * hw * cp * 4,
    )

    out = pl.pallas_call(
        _kconv_bnr_kernel,
        out_shape=jax.ShapeDtypeStruct((n, hw, cp), jnp.float32),
        grid=grid,
        in_specs=[
            pl.BlockSpec((1, tile, 9 * cp), lambda b, s: (b, s, 0)),
            # Constant block index -> Pallas keeps the weights resident (no re-DMA
            # between consecutive grid steps).
            pl.BlockSpec((9 * cp, cp), lambda b, s: (0, 0)),
            pl.BlockSpec((8, cp), lambda b, s: (0, 0)),
        ],
        out_specs=pl.BlockSpec((1, tile, cp), lambda b, s: (b, s, 0)),
        compiler_params=pltpu.CompilerParams(
            dimension_semantics=("parallel", "parallel"),
            vmem_limit_bytes=64 * 1024 * 1024,
        ),
        cost_estimate=cost,
    )(x9, w3, bn)

    out = out[:, :, :c].reshape(n, h, w, c)
    return jnp.transpose(out, (0, 3, 1, 2))                        # back to NCHW


def _reference(x_nchw, w3_hwio, gamma, beta, mean, var, eps=1e-5,
               conv_dtype=jnp.bfloat16):
    """Pure-JAX reference: Conv3x3(pad 1, no bias) -> eval-mode BN -> ReLU.

    conv_dtype=bfloat16 matches the kernel's bf16 matmul operands (f32 accumulate);
    pass jnp.float32 for the exact full-precision forward.
    """
    x = jnp.transpose(x_nchw, (0, 2, 3, 1))
    y = jax.lax.conv_general_dilated(
        x.astype(conv_dtype), w3_hwio.astype(conv_dtype),
        window_strides=(1, 1), padding=((1, 1), (1, 1)),
        dimension_numbers=("NHWC", "HWIO", "NHWC"),
        preferred_element_type=jnp.float32)
    scale = gamma / jnp.sqrt(var + eps)
    y = jnp.maximum(y * scale + (beta - mean * scale), 0.0)
    return jnp.transpose(y, (0, 3, 1, 2))


if __name__ == "__main__":
    key = jax.random.PRNGKey(0)
    k = jax.random.split(key, 6)

    N, C, H, W = 2, 8, 16, 16
    x = jax.random.normal(k[0], (N, C, H, W), jnp.float32)

    # Conv3x3 weights (HWIO), no bias.
    w3_hwio = 0.1 * jax.random.normal(k[1], (3, 3, C, C), jnp.float32)
    # BatchNorm parameters + running stats (eval-mode BN).
    bn_gamma = 1.0 + 0.2 * jax.random.normal(k[2], (C,), jnp.float32)
    bn_beta = 0.1 * jax.random.normal(k[3], (C,), jnp.float32)
    bn_mean = 0.1 * jax.random.normal(k[4], (C,), jnp.float32)
    bn_var = 0.5 + jnp.abs(jax.random.normal(k[5], (C,), jnp.float32))

    out = kconv_bnr(x, w3_hwio, bn_gamma, bn_beta, bn_mean, bn_var)
    out = jax.block_until_ready(out)

    # Compare against a reference whose conv inputs carry the same bf16 rounding
    # as the kernel's matmul operands (accumulation & epilogue are f32 in both).
    ref = _reference(x, w3_hwio, bn_gamma, bn_beta, bn_mean, bn_var,
                     conv_dtype=jnp.bfloat16)
    assert out.shape == (N, C, H, W)
    assert jnp.allclose(out, ref, rtol=1e-3, atol=1e-3), "mismatch vs reference"

    print("KERNEL_OK")
</pallas_src>

<mosaic_0001>
module attributes {stable_mosaic.version = 11 : i64} {
  func.func @_kconv_bnr_kernel(%arg0: i32, %arg1: i32, %arg2: memref<1x256x1152xbf16, #tpu.memory_space<vmem>>, %arg3: memref<1152x128xbf16, #tpu.memory_space<vmem>>, %arg4: memref<8x128xf32, #tpu.memory_space<vmem>>, %arg5: memref<1x256x128xf32, #tpu.memory_space<vmem>>) attributes {dimension_semantics = [#tpu.dimension_semantics<parallel>, #tpu.dimension_semantics<parallel>], iteration_bounds = array<i64: 2, 1>, scalar_prefetch = 0 : i64, scratch_operands = 0 : i64, tpu.core_type = #tpu.core_type<tc>, window_params = [{transform_indices = @transform_0, window_bounds = array<i64: 1, 256, 1152>}, {pipeline_mode = #tpu.pipeline_mode<synchronous>, transform_indices = @transform_1, window_bounds = array<i64: 1152, 128>}, {pipeline_mode = #tpu.pipeline_mode<synchronous>, transform_indices = @transform_2, window_bounds = array<i64: 8, 128>}, {transform_indices = @transform_3, window_bounds = array<i64: 1, 256, 128>}]} {
    %c0 = arith.constant 0 : index
    %c0_0 = arith.constant 0 : index
    %c0_1 = arith.constant 0 : index
    %0 = vector.load %arg2[%c0, %c0_0, %c0_1] : memref<1x256x1152xbf16, #tpu.memory_space<vmem>>, vector<1x256x1152xbf16>
    %1 = vector.shape_cast %0 : vector<1x256x1152xbf16> to vector<256x1152xbf16>
    %c0_2 = arith.constant 0 : index
    %c0_3 = arith.constant 0 : index
    %2 = vector.load %arg3[%c0_2, %c0_3] : memref<1152x128xbf16, #tpu.memory_space<vmem>>, vector<1152x128xbf16>
    %cst = arith.constant dense<0.000000e+00> : vector<256x128xf32>
    %3 = tpu.matmul %1, %2, %cst {dimension_numbers = #tpu.dot_dimension_numbers<[1], [0], [0], [1], [0, 0, 1, 1], [], []>} : vector<256x1152xbf16>, vector<1152x128xbf16>, vector<256x128xf32> -> vector<256x128xf32>
    %c0_4 = arith.constant 0 : index
    %c0_5 = arith.constant 0 : index
    %4 = vector.load %arg4[%c0_4, %c0_5] : memref<8x128xf32, #tpu.memory_space<vmem>>, vector<8x128xf32>
    %5 = vector.extract_strided_slice %4 {offsets = [0, 0], sizes = [1, 128], strides = [1, 1]} : vector<8x128xf32> to vector<1x128xf32>
    %6 = vector.extract_strided_slice %4 {offsets = [1, 0], sizes = [1, 128], strides = [1, 1]} : vector<8x128xf32> to vector<1x128xf32>
    %7 = vector.broadcast %5 : vector<1x128xf32> to vector<256x128xf32>
    %8 = arith.mulf %3, %7 : vector<256x128xf32>
    %9 = vector.broadcast %6 : vector<1x128xf32> to vector<256x128xf32>
    %10 = arith.addf %8, %9 : vector<256x128xf32>
    %cst_6 = arith.constant 0.000000e+00 : f32
    %11 = vector.broadcast %cst_6 : f32 to vector<256x128xf32>
    %12 = arith.maximumf %10, %11 : vector<256x128xf32>
    %c0_7 = arith.constant 0 : index
    %c0_8 = arith.constant 0 : index
    %c0_9 = arith.constant 0 : index
    %13 = vector.load %arg5[%c0_7, %c0_8, %c0_9] : memref<1x256x128xf32, #tpu.memory_space<vmem>>, vector<1x256x128xf32>
    %14 = vector.shape_cast %13 : vector<1x256x128xf32> to vector<256x128xf32>
    %15 = vector.shape_cast %12 : vector<256x128xf32> to vector<1x256x128xf32>
    tpu.vector_store %arg5[%c0_7, %c0_8, %c0_9], %15 {strides = array<i32>} : memref<1x256x128xf32, #tpu.memory_space<vmem>>, vector<1x256x128xf32>,
    return
  }
  func.func @transform_0(%arg0: i32, %arg1: i32) -> (i32, i32, i32) {
    %c0_i32 = arith.constant 0 : i32
    %c0_i32_0 = arith.constant 0 : i32
    return %arg0, %arg1, %c0_i32 : i32, i32, i32
  }
  func.func @transform_1(%arg0: i32, %arg1: i32) -> (i32, i32) {
    %c0_i32 = arith.constant 0 : i32
    %c0_i32_0 = arith.constant 0 : i32
    %c0_i32_1 = arith.constant 0 : i32
    return %c0_i32, %c0_i32_0 : i32, i32
  }
  func.func @transform_2(%arg0: i32, %arg1: i32) -> (i32, i32) {
    %c0_i32 = arith.constant 0 : i32
    %c0_i32_0 = arith.constant 0 : i32
    %c0_i32_1 = arith.constant 0 : i32
    return %c0_i32, %c0_i32_0 : i32, i32
  }
  func.func @transform_3(%arg0: i32, %arg1: i32) -> (i32, i32, i32) {
    %c0_i32 = arith.constant 0 : i32
    %c0_i32_0 = arith.constant 0 : i32
    return %arg0, %arg1, %c0_i32 : i32, i32, i32
  }
}

</mosaic_0001>

<bundles_post_ra>
// kernel: tpu_custom_call.1
= control target key start
LH: loop header
LB: loop body
LE: loop exit
PB: predicated region body
PF: predicated region fallthrough
CT: control target
= control target key end

     0   :  { %8 = vsyncpa [#allocation3], 0  ;;  %s4967_s0 = inlined_call_operand.hbm [shape: bf16[2,256,1152], index: 0, kind: input, shape index: {}]   ;;  %s4968_s1 = inlined_call_operand.hbm [shape: bf16[1152,128], index: 1, kind: input, shape index: {}]   ;;  %s4969_s2 = inlined_call_operand.hbm [shape: f32[8,128], index: 2, kind: input, shape index: {}]   ;;  %s4970_s3 = inlined_call_operand.hbm [shape: f32[2,256,128], index: 3, kind: output, shape index: {}]  }
   0x1   :  { %10 = vsyncpa [#allocation3 + $0x1], 0 }
   0x2   :  { %11 = vsyncpa [#allocation6], 0 }
   0x3   :  { %12 = vsyncpa [#allocation4], 0 }
   0x4   :  { %14 = vsyncpa [#allocation4 + $0x1], 0  ;;  %s4111_s12 = smov 0   ;;  %s4113_s13 = smov 0  }
   0x5   :  { %s4115_s14 = smov 0   ;;  %s4117_s15 = smov 0  }
   0x6   :  { %s4119_s16 = smov 0   ;;  %s4121_s17 = smov 0  }
   0x7 LB: > { %s2774_s18 = sadd.s32 4294967295, %s4079_s17   ;;  %s2775_s19 = sadd.s32 4294967294, %s4079_s17   ;;  %s4079_s17 = sphi %s4121_s17, %s20_s17   ;;  %s4075_s16 = sphi %s4119_s16, %s5018_s16   ;;  %s4071_s15 = sphi %s4117_s15, %s5017_s15   ;;  %s4067_s14 = sphi %s4115_s14, %s5016_s14   ;;  %s4063_s13 = sphi %s4113_s13, %s5015_s13   ;;  %s4059_s12 = sphi %s4111_s12, %s5014_s12  }
   0x8   : > { %p54_p0 = scmp.ne.s32.totalorder %s4063_s13, %s4059_s12  ;;  %p4145_p1 = scmp.eq.s32.totalorder %s2774_s18, 0 }
   0x9   : > { %p4149_p2 = scmp.eq.s32.totalorder %s2774_s18, 1  ;;  %p128_p3 = scmp.eq.s32.totalorder %s2775_s19, 1 }
   0xa   : > { %s4974_s20 = scalar_select %p4145_p1, 1, 0 }
   0xb   : > { %p4155_p4 = por %p4145_p1, %p54_p0  ;;  %p2776_p5 = scmp.ge.s32.totalorder %s4079_s17, 1 }
   0xc   : > { %p4160_p6 = por %p128_p3, %p54_p0  ;;  %p135_p7 = scmp.lt.s32.totalorder %s4079_s17, 3 }
   0xd   : > { %s4976_s22 = scalar_select %p4155_p4, 1, 0 }
   0xe   : > { %s4977_s23 = scalar_select %p4160_p6, 1, 0 }
   0xf   : > { %p4165_p8 = pnand %p2776_p5, %p135_p7  ;;  %s4081_s25 = smov [#allocation5]  }
  0x10   : > { %s147_s26 = sshll.u32 %s4081_s25, 4  ;;  %s4082_s28 = smov [#allocation7]   ;;  %s148_s26 = int_to_ptr.vmem [resolvable:$true] %s147_s26 }
  0x11   : > { %p3558_p9 = pneg %p4165_p8  ;;  %s161_s29 = sshll.u32 %s4082_s28, 4  ;;  %s162_s29 = int_to_ptr.vmem [resolvable:$true] %s161_s29 }
  0x12   : > { %s3926_s30 = scalar_lea.vmem %s148_s26, 9216  ;;  %p3934_p5 = scmp.lt.s32.totalorder %s148_s26, %s148_s26 }
  0x13   : > { %p4174_p11 = pnand %p3558_p9, %p4145_p1  ;;  %p3927_p13 = scmp.ne.s32.totalorder %s148_s26, %s3926_s30 }
  0x14   : > { %p3935_p7 = scmp.lt.s32.totalorder %s3926_s30, %s3926_s30 }
  0x15   : > { %p3917_p12 = pneg %p4174_p11 }
  0x16   : > { %p3936_p10 = por %p3935_p7, %p3934_p5 }
  0x17   : > { %p3929_p0 = pnand %p3927_p13, %p3917_p12 }
  0x19   : > { %p3930_p3 = pneg %p3929_p0 }
  0x1b   : > { %p3937_p9 = pnand %p3936_p10, %p3930_p3 }
  0x1d   : > { %3940 = shalt.err (!%p3937_p9)
}
  0x1e   : > { %s4083_s4 = smov 64   ;;  %s4084_s5 = smov 4  }
  0x1f   : > { %3561 = dma.hbm_to_vmem [thread:$0]  (!%p4174_p11), %s4968_s1, 9216, %s148_s26, [#allocation6], %s4083_s4, %s4083_s4, %s4084_s5  }
  0x20   : > { %s3952_s8 = scalar_lea.vmem %s162_s29, 128  ;;  %p3960_p1 = scmp.lt.s32.totalorder %s162_s29, %s162_s29 }
  0x21   : > { %p3953_p6 = scmp.ne.s32.totalorder %s162_s29, %s3952_s8  ;;  %p3961_p4 = scmp.lt.s32.totalorder %s3952_s8, %s3952_s8 }
  0x23   : > { %p3955_p13 = pnand %p3953_p6, %p3917_p12  ;;  %p3962_p5 = por %p3961_p4, %p3960_p1 }
  0x25   : > { %p3956_p0 = pneg %p3955_p13 }
  0x27   : > { %p3963_p10 = pnand %p3962_p5, %p3956_p0 }
  0x29   : > { %3966 = shalt.err (!%p3963_p10)
}
  0x2a   : > { %3564 = dma.hbm_to_vmem [thread:$0]  (!%p4174_p11), %s4969_s2, 128, %s162_s29, [#allocation6]  }
  0x2b   : > { %s32_s11 = sadd.s32 1, %s4075_s16  ;;  %s41_s18 = sadd.s32 1, %s4067_s14 }
  0x2c   : > { %p34_p1 = scmp.ge.s32.totalorder %s32_s11, 2  ;;  %p48_p4 = scmp.ne.s32.totalorder %s4067_s14, %s4063_s13 }
  0x2d   : > { %p49_p6 = scmp.eq.s32.totalorder %s4079_s17, 0  ;;  %p3575_p12 = scmp.lt.s32.totalorder %s4079_s17, 2 }
  0x2e   : > { %s5020_s11 = smov (%p34_p1, %s32_s11), 0  ;;  %p4206_p7 = por %p4149_p2, %p48_p4 }
  0x2f   : > { %p50_p3 = por %p49_p6, %p48_p4  ;;  %s36_s25 = ssub.s32 %s4075_s16, %s5020_s11 }
  0x30   : > { %s172_s26 = sand.u32 1, %s4067_s14   ;;  %p39_p9 = scmp.eq.s32.totalorder %s36_s25, 0 }
  0x31   : > { %s3543_s27 = smul.u32 1152, %s172_s26  ;;  %p4213_p11 = pnand %p3575_p12, %p50_p3 }
  0x32   : > { %s4218_s29 = scalar_select %p39_p9, %s4067_s14, %s41_s18  }
  0x33   : > { %s3544_s30 = smul.u32 18432, %s4075_s16  ;;  %s176_s4 = scalar_lea.vmem [#allocation2], %s3543_s27 }
  0x34   : > { %s186_s5 = sshll.u32 %s176_s4, 4  ;;  %s173_s8 = scalar_lea.sflag [#allocation3], %s172_s26  ;;  %s187_s5 = int_to_ptr.vmem [resolvable:$true] %s186_s5 }
  0x35   : > { %s185_s7 = scalar_lea.hbm %s4967_s0, %s3544_s30  ;;  %p3969_p2 = pneg %p4213_p11 }
  0x36   : > { %s3980_s9 = scalar_lea.vmem %s187_s5, 18432  ;;  %s4085_s10 = smov [#allocation2]  }
  0x37   : > { %p3981_p13 = scmp.ne.s32.totalorder %s187_s5, %s3980_s9  ;;  %s3985_s25 = sshll.u32 %s4085_s10, 4  ;;  %s3986_s25 = int_to_ptr.vmem [resolvable:$false] %s3985_s25 }
  0x38   : > { %s3987_s18 = scalar_lea.vmem %s3986_s25, 36864  ;;  %p3988_p10 = scmp.lt.s32.totalorder %s187_s5, %s3986_s25 }
  0x39   : > { %p3983_p0 = pnand %p3981_p13, %p3969_p2  ;;  %p3989_p1 = scmp.lt.s32.totalorder %s3987_s18, %s3980_s9 }
  0x3b   : > { %p3984_p5 = pneg %p3983_p0  ;;  %p3990_p4 = por %p3989_p1, %p3988_p10 }
  0x3d   : > { %p3991_p6 = pnand %p3990_p4, %p3984_p5 }
  0x3f   : > { %3994 = shalt.err (!%p3991_p6)
}
  0x40   : > { %s4086_s27 = smov 576   ;;  %s4087_s30 = smov 36  }
  0x41   : > { %3568 = dma.hbm_to_vmem [thread:$0]  (!%p4213_p11), %s185_s7, 18432, %s187_s5, %s173_s8, %s4086_s27, %s4086_s27, %s4087_s30  }
  0x42   : > { %198 = sbr.rel (%p4165_p8) target bundleno = 617 (0x269), region = 32 }
  0x47   : > { %s4231_s26 = sand.u32 1, %s4063_s13   ;;  %p4982_p12 = scmp.ne.s32.totalorder %s4976_s22, 0 }
  0x48   : > { %s3545_s4 = smul.u32 1152, %s4231_s26  ;;  %s201_s6 = scalar_lea.sflag [#allocation3], %s4231_s26 }
  0x4a   : > { %s4235_s21 = scalar_lea.vmem [#allocation2], %s3545_s4 }
  0x4b   : > { %4046 = dma.done.wait (%p4982_p12), %s201_s6, 18432  }
  0x4c   : > { %4048 = vsyncadd (%p4982_p12), %s201_s6, 4294948864  ;;  %p4983_p3 = scmp.ne.s32.totalorder %s4974_s20, 0 }
  0x4e   : > { %4050 = dma.done.wait (%p4983_p3), [#allocation6], 9344  }
  0x4f   : > { %4052 = vsyncadd (%p4983_p3), [#allocation6], 4294957952  ;;  %v3635_v0 = vld [vmem:[#allocation5 + $0x78] sm:$0xff]   ;;  %v3637_v2 = vld [vmem:[#allocation5 + $0x70] sm:$0xff]   ;;  %s2784_s20 = sshll.u32 %s4231_s26, 8  ;;  %s3006_s24 = sshll.u32 %s4071_s15, 12 }
  0x50   : > { %v3636_v1 = vld [vmem:[#allocation5 + $0x38] sm:$0xff]   ;;  %3007 = vmatprep.subr.bf16.mxu0 %v3635_v0  ;;  %3527 = vmatprep.subr.bf16.mxu1 %v3635_v0  ;;  %v3638_v3 = vld [vmem:[#allocation5 + $0x30] sm:$0xff]   ;;  %v3639_v4 = vld [vmem:[#allocation5 + $0x68] sm:$0xff]   ;;  %s4748_s22 = scalar_lea.vmem [#allocation8], %s2784_s20  ;;  %s4916_s8 = scalar_lea.hbm %s4970_s3, %s3006_s24 }
  0x51   : > { %3008 = vmatpush3.bf16.msra.mxu0 %v3636_v1  ;;  %3535 = vmatpush3.bf16.msra.mxu1 %v3636_v1  ;;  %v3640_v5 = vld [vmem:[#allocation5 + $0x28] sm:$0xff]   ;;  %v3641_v6 = vld [vmem:[#allocation5 + $0x60] sm:$0xff]   ;;  %v3643_v8 = vld [vmem:[#allocation5 + $0x58] sm:$0xff]   ;;  %s2668_s28 = sshll.u32 %s4748_s22, 4  ;;  %s2653_s9 = scalar_lea.sflag [#allocation4], %s4231_s26  ;;  %s4918_s28 = int_to_ptr.vmem [resolvable:$true] %s2668_s28 }
  0x52   : > { %3009 = vmatprep.subr.bf16.mxu0 %v3637_v2  ;;  %3528 = vmatprep.subr.bf16.mxu1 %v3637_v2  ;;  %v3642_v7 = vld [vmem:[#allocation5 + $0x20] sm:$0xff]   ;;  %v3644_v9 = vld [vmem:[#allocation5 + $0x18] sm:$0xff]   ;;  %v3645_v10 = vld [vmem:[#allocation5 + $0x50] sm:$0xff]   ;;  %s3995_s10 = scalar_lea.vmem %s4918_s28, 4096  ;;  %s4088_s15 = smov [#allocation8]  }
  0x53   : > { %v3653_v11 = vld [vmem:[%s4235_s21 + $0x4] ss:$36 sps:$4 sm:$0xff]   ;;  %v3646_v13 = vld [vmem:[#allocation5 + $0x10] sm:$0xff]   ;;  %v3657_v18 = vld [vmem:[#allocation5 + $0xf8] sm:$0xff]   ;;  %p3996_p8 = scmp.ne.s32.totalorder %s4918_s28, %s3995_s10  ;;  %s3999_s25 = sshll.u32 %s4088_s15, 4  ;;  %s4000_s25 = int_to_ptr.vmem [resolvable:$false] %s3999_s25 }
  0x54   : > { %v3656_v12 = vld [vmem:[%s4235_s21 + $0x364] ss:$36 sps:$4 sm:$0xff]   ;;  %1742 = vmatprep.mubr.bf16.mxu0 %v3653_v11  ;;  %v3660_v21 = vld [vmem:[#allocation5 + $0x178] sm:$0xff]   ;;  %v3659_v23 = vld [vmem:[#allocation5 + $0xf0] sm:$0xff]   ;;  %s4001_s18 = scalar_lea.vmem %s4000_s25, 8192  ;;  %p4002_p2 = scmp.lt.s32.totalorder %s4918_s28, %s4000_s25 }
  0x55   : > { %3010 = vmatpush3.bf16.msra.mxu0 %v3638_v3  ;;  %3536 = vmatpush3.bf16.msra.mxu1 %v3638_v3  ;;  %v3647_v14 = vld [vmem:[#allocation5 + $0x48] sm:$0xff]   ;;  %v3649_v16 = vld [vmem:[#allocation5 + $0x40] sm:$0xff]   ;;  %v3658_v22 = vld [vmem:[#allocation5 + $0xb8] sm:$0xff]   ;;  %p3997_p9 = pnand %p3996_p8, %p4206_p7  ;;  %p4003_p13 = scmp.lt.s32.totalorder %s4001_s18, %s3995_s10 }
  0x56   : > { %3011 = vmatprep.subr.bf16.mxu0 %v3639_v4  ;;  %3529 = vmatprep.subr.bf16.mxu1 %v3639_v4  ;;  %v3648_v15 = vld [vmem:[#allocation5 + $0x8] sm:$0xff]   ;;  %v3650_v17 = vld [vmem:[#allocation5] sm:$0xff]   ;;  %v3662_v24 = vld [vmem:[#allocation5 + $0x138] sm:$0xff]  }
  0x57   : > { %1838 = vmatprep.mubr.bf16.mxu1 %v3656_v12  ;;  %v3651_v19 = vld [vmem:[%s4235_s21] ss:$36 sps:$4 sm:$0xff]   ;;  %v3663_v25 = vld [vmem:[%s4235_s21 + $0x4c] ss:$36 sps:$4 sm:$0xff]   ;;  %v3673_v35 = vld [vmem:[%s4235_s21 + $0x94] ss:$36 sps:$4 sm:$0xff]   ;;  %p3998_p11 = pneg %p3997_p9  ;;  %p4004_p0 = por %p4003_p13, %p4002_p2 }
  0x58   : > { %v3654_v20 = vld [vmem:[%s4235_s21 + $0x360] ss:$36 sps:$4 sm:$0xff]   ;;  %v3665_v26 = vld [vmem:[%s4235_s21 + $0x3ac] ss:$36 sps:$4 sm:$0xff]   ;;  %v3675_v36 = vld [vmem:[%s4235_s21 + $0x3f4] ss:$36 sps:$4 sm:$0xff]  }
  0x59   : > { %3012 = vmatpush3.bf16.msra.mxu0 %v3640_v5  ;;  %3537 = vmatpush3.bf16.msra.mxu1 %v3640_v5  ;;  %v3661_v27 = vld [vmem:[#allocation5 + $0xb0] sm:$0xff]   ;;  %v3667_v29 = vld [vmem:[%s4235_s21 + $0x48] ss:$36 sps:$4 sm:$0xff]   ;;  %v3671_v34 = vld [vmem:[#allocation5 + $0xe0] sm:$0xff]   ;;  %p4005_p5 = pnand %p4004_p0, %p3998_p11 }
  0x5a   : > { %3013 = vmatprep.subr.bf16.mxu0 %v3641_v6  ;;  %3530 = vmatprep.subr.bf16.mxu1 %v3641_v6  ;;  %v3680_v28 = vld [vmem:[#allocation5 + $0x170] sm:$0xff]   ;;  %v3668_v30 = vld [vmem:[%s4235_s21 + $0x3a8] ss:$36 sps:$4 sm:$0xff]   ;;  %v3672_v37 = vld [vmem:[#allocation5 + $0xa0] sm:$0xff]  }
  0x5b   : > { %v3669_v31 = vld [vmem:[#allocation5 + $0xe8] sm:$0xff]   ;;  %v3682_v33 = vld [vmem:[#allocation5 + $0x130] sm:$0xff]   ;;  %v3679_v40 = vld [vmem:[#allocation5 + $0xd8] sm:$0xff]  }
  0x5c   : > { %v3670_v32 = vld [vmem:[#allocation5 + $0xa8] sm:$0xff]   ;;  %v3677_v38 = vld [vmem:[%s4235_s21 + $0x90] ss:$36 sps:$4 sm:$0xff]   ;;  %v3681_v41 = vld [vmem:[#allocation5 + $0x98] sm:$0xff]  }
  0x5d   : > { %3014 = vmatpush3.bf16.msra.mxu0 %v3642_v7  ;;  %3538 = vmatpush3.bf16.msra.mxu1 %v3642_v7  ;;  %v3678_v39 = vld [vmem:[%s4235_s21 + $0x3f0] ss:$36 sps:$4 sm:$0xff]   ;;  %v3694_v43 = vld [vmem:[#allocation5 + $0x168] sm:$0xff]   ;;  %v3685_v44 = vld [vmem:[%s4235_s21 + $0xdc] ss:$36 sps:$4 sm:$0xff]  }
  0x5e   : > { %3015 = vmatprep.subr.bf16.mxu0 %v3643_v8  ;;  %3531 = vmatprep.subr.bf16.mxu1 %v3643_v8  ;;  %v3683_v42 = vld [vmem:[#allocation5 + $0xd0] sm:$0xff]   ;;  %v3687_v45 = vld [vmem:[%s4235_s21 + $0x43c] ss:$36 sps:$4 sm:$0xff]   ;;  %v3696_v46 = vld [vmem:[#allocation5 + $0x128] sm:$0xff]  }
  0x5f   : > { %v3684_v47 = vld [vmem:[#allocation5 + $0x90] sm:$0xff]   ;;  %v3691_v48 = vld [vmem:[#allocation5 + $0xc8] sm:$0xff]   ;;  %v3689_v49 = vld [vmem:[%s4235_s21 + $0xd8] ss:$36 sps:$4 sm:$0xff]  }
  0x60   : > { %v3690_v50 = vld [vmem:[%s4235_s21 + $0x438] ss:$36 sps:$4 sm:$0xff]   ;;  %v3692_v51 = vld [vmem:[#allocation5 + $0x88] sm:$0xff]   ;;  %v3693_v52 = vld [vmem:[#allocation5 + $0xc0] sm:$0xff]  }
  0x61   : > { %3016 = vmatpush3.bf16.msra.mxu0 %v3644_v9  ;;  %3539 = vmatpush3.bf16.msra.mxu1 %v3644_v9  ;;  %v3697_v53 = vld [vmem:[%s4235_s21 + $0x124] ss:$36 sps:$4 sm:$0xff]   ;;  %v3701_v54 = vld [vmem:[%s4235_s21 + $0xc] ss:$36 sps:$4 sm:$0xff]   ;;  %v3703_v60 = vld [vmem:[#allocation5 + $0x1f8] sm:$0xff]  }
  0x62   : > { %3017 = vmatprep.subr.bf16.mxu0 %v3645_v10  ;;  %3532 = vmatprep.subr.bf16.mxu1 %v3645_v10  ;;  %v3711_v55 = vld [vmem:[#allocation5 + $0x160] sm:$0xff]   ;;  %v3699_v58 = vld [vmem:[%s4235_s21 + $0x8] ss:$36 sps:$4 sm:$0xff]   ;;  %v3704_v61 = vld [vmem:[#allocation5 + $0x1b8] sm:$0xff]  }
  0x63   : > { %v3712_v56 = vld [vmem:[#allocation5 + $0x120] sm:$0xff]   ;;  %v3705_v62 = vld [vmem:[%s4235_s21 + $0x16c] ss:$36 sps:$4 sm:$0xff]   ;;  %v3707_v63 = vld [vmem:[%s4235_s21 + $0x54] ss:$36 sps:$4 sm:$0xff]  }
  0x64   : > { %v3695_v57 = vld [vmem:[#allocation5 + $0x80] sm:$0xff]   ;;  %v3721_v0 = vld [vmem:[#allocation5 + $0x158] sm:$0xff]   ;;  %v3719_v1 = vld [vmem:[#allocation5 + $0x1f0] sm:$0xff]  }
  0x65   : > { %3018 = vmatpush3.bf16.msra.mxu0 %v3646_v13  ;;  %3540 = vmatpush3.bf16.msra.mxu1 %v3646_v13  ;;  %v3702_v59 = vld [vmem:[%s4235_s21 + $0x120] ss:$36 sps:$4 sm:$0xff]   ;;  %v3722_v2 = vld [vmem:[#allocation5 + $0x118] sm:$0xff]   ;;  %v3720_v3 = vld [vmem:[#allocation5 + $0x1b0] sm:$0xff]  }
  0x66   : > { %3019 = vmatprep.subr.bf16.mxu0 %v3647_v14  ;;  %3533 = vmatprep.subr.bf16.mxu1 %v3647_v14  ;;  %v3709_v4 = vld [vmem:[%s4235_s21 + $0x168] ss:$36 sps:$4 sm:$0xff]   ;;  %v3710_v5 = vld [vmem:[%s4235_s21 + $0x50] ss:$36 sps:$4 sm:$0xff]   ;;  %v3715_v7 = vld [vmem:[%s4235_s21 + $0x9c] ss:$36 sps:$4 sm:$0xff]  }
  0x67   : > { %v3713_v6 = vld [vmem:[%s4235_s21 + $0x1b4] ss:$36 sps:$4 sm:$0xff]   ;;  %v3736_v9 = vld [vmem:[#allocation5 + $0x1e8] sm:$0xff]   ;;  %v3723_v14 = vld [vmem:[%s4235_s21 + $0x1fc] ss:$36 sps:$4 sm:$0xff]  }
  0x68   : > { %v3735_v8 = vld [vmem:[#allocation5 + $0x150] sm:$0xff]   ;;  %v3738_v11 = vld [vmem:[#allocation5 + $0x1a8] sm:$0xff]   ;;  %v3718_v13 = vld [vmem:[%s4235_s21 + $0x98] ss:$36 sps:$4 sm:$0xff]  }
  0x69   : > { %3020 = vmatpush3.bf16.msra.mxu0 %v3648_v15  ;;  %3541 = vmatpush3.bf16.msra.mxu1 %v3648_v15  ;;  %v3737_v10 = vld [vmem:[#allocation5 + $0x110] sm:$0xff]   ;;  %v3745_v15 = vld [vmem:[#allocation5 + $0x148] sm:$0xff]  }
  0x6a   : > { %3021 = vmatprep.subr.bf16.mxu0 %v3649_v16  ;;  %3534 = vmatprep.subr.bf16.mxu1 %v3649_v16  ;;  %v3717_v12 = vld [vmem:[%s4235_s21 + $0x1b0] ss:$36 sps:$4 sm:$0xff]   ;;  %v3746_v16 = vld [vmem:[#allocation5 + $0x108] sm:$0xff]  }
  0x6d   : > { %3022 = vmatpush3.bf16.msra.mxu0 %v3650_v17  ;;  %3542 = vmatpush3.bf16.msra.mxu1 %v3650_v17  ;;  %v3725_v17 = vld [vmem:[%s4235_s21 + $0xe4] ss:$36 sps:$4 sm:$0xff]  }
  0x6e   : > { %3119 = vmatprep.subr.bf16.mxu1 %v3657_v18  ;;  %3231 = vmatprep.subr.bf16.mxu0 %v3660_v21  ;;  %v3753_v18 = vld [vmem:[#allocation5 + $0x1e0] sm:$0xff]  }
  0x6f   : > { %v3728_v21 = vld [vmem:[%s4235_s21 + $0xe0] ss:$36 sps:$4 sm:$0xff]  }
  0x70   : > { %1743 = vmatmul.mubr.bf16.vlgmr.msra.gmra.mxu0 %v3651_v19  ;;  %1839 = vmatmul.mubr.bf16.vlgmr.msra.gmra.mxu1 %v3654_v20  ;;  %v3754_v19 = vld [vmem:[#allocation5 + $0x1a0] sm:$0xff]   ;;  %v3727_v20 = vld [vmem:[%s4235_s21 + $0x1f8] ss:$36 sps:$4 sm:$0xff]  }
  0x71   : > { %3120 = vmatpush3.bf16.msra.mxu1 %v3658_v22  ;;  %3232 = vmatpush3.bf16.msra.mxu0 %v3662_v24  ;;  %v3729_v22 = vld [vmem:[%s4235_s21 + $0x244] ss:$36 sps:$4 sm:$0xff]  }
  0x72   : > { %3121 = vmatprep.subr.bf16.mxu1 %v3659_v23  ;;  %1750 = vmatprep.mubr.bf16.mxu0 %v3663_v25  ;;  %v3731_v23 = vld [vmem:[%s4235_s21 + $0x12c] ss:$36 sps:$4 sm:$0xff]   ;;  %v3761_v24 = vld [vmem:[#allocation5 + $0x140] sm:$0xff]  }
  0x73   : > { %1846 = vmatprep.mubr.bf16.mxu1 %v3665_v26  ;;  %3233 = vmatprep.subr.bf16.mxu0 %v3680_v28  ;;  %v3762_v25 = vld [vmem:[#allocation5 + $0x100] sm:$0xff]   ;;  %v3769_v26 = vld [vmem:[#allocation5 + $0x1d8] sm:$0xff]  }
  0x74   : > { %v3770_v28 = vld [vmem:[#allocation5 + $0x198] sm:$0xff]  }
  0x75   : > { %3122 = vmatpush3.bf16.msra.mxu1 %v3661_v27  ;;  %3234 = vmatpush3.bf16.msra.mxu0 %v3682_v33  ;;  %v3733_v27 = vld [vmem:[%s4235_s21 + $0x240] ss:$36 sps:$4 sm:$0xff]   ;;  %v3784_v33 = vld [vmem:[#allocation5 + $0x1d0] sm:$0xff]  }
  0x76   : > { %3123 = vmatprep.subr.bf16.mxu1 %v3669_v31  ;;  %3235 = vmatprep.subr.bf16.mxu0 %v3694_v43  ;;  %v3739_v31 = vld [vmem:[%s4235_s21 + $0x28c] ss:$36 sps:$4 sm:$0xff]   ;;  %v3755_v43 = vld [vmem:[%s4235_s21 + $0x31c] ss:$36 sps:$4 sm:$0xff]  }
  0x78   : > { %1751 = vmatmul.mubr.bf16.gmra.mxu0 %v3667_v29  ;;  %1847 = vmatmul.mubr.bf16.gmra.mxu1 %v3668_v30  ;;  %v3771_v29 = vld [vmem:[#allocation5 + $0x238] sm:$0xff]   ;;  %v3734_v30 = vld [vmem:[%s4235_s21 + $0x128] ss:$36 sps:$4 sm:$0xff]  }
  0x79   : > { %3124 = vmatpush3.bf16.msra.mxu1 %v3670_v32  ;;  %1758 = vmatprep.mubr.bf16.mxu0 %v3673_v35  ;;  %v3741_v32 = vld [vmem:[%s4235_s21 + $0x174] ss:$36 sps:$4 sm:$0xff]  }
  0x7a   : > { %3125 = vmatprep.subr.bf16.mxu1 %v3671_v34  ;;  %1854 = vmatprep.mubr.bf16.mxu1 %v3675_v36  ;;  %v3743_v34 = vld [vmem:[%s4235_s21 + $0x288] ss:$36 sps:$4 sm:$0xff]   ;;  %v3785_v35 = vld [vmem:[#allocation5 + $0x190] sm:$0xff]  }
  0x7b   : > { %3236 = vmatpush3.bf16.msra.mxu0 %v3696_v46  ;;  %v3744_v36 = vld [vmem:[%s4235_s21 + $0x170] ss:$36 sps:$4 sm:$0xff]   ;;  %v3760_v46 = vld [vmem:[%s4235_s21 + $0x200] ss:$36 sps:$4 sm:$0xff]  }
  0x7c   : > { %3237 = vmatprep.subr.bf16.mxu0 %v3711_v55  ;;  %v3786_v55 = vld [vmem:[#allocation5 + $0x230] sm:$0xff]  }
  0x7d   : > { %3126 = vmatpush3.bf16.msra.mxu1 %v3672_v37  ;;  %v3747_v37 = vld [vmem:[%s4235_s21 + $0x2d4] ss:$36 sps:$4 sm:$0xff]  }
  0x7e   : > { %3127 = vmatprep.subr.bf16.mxu1 %v3679_v40  ;;  %v3752_v40 = vld [vmem:[%s4235_s21 + $0x1b8] ss:$36 sps:$4 sm:$0xff]  }
  0x7f   : > { %3238 = vmatpush3.bf16.msra.mxu0 %v3712_v56  ;;  %v3801_v56 = vld [vmem:[#allocation5 + $0x228] sm:$0xff]  }
  0x80   : > { %1759 = vmatmul.mubr.bf16.gmra.mxu0 %v3677_v38  ;;  %1855 = vmatmul.mubr.bf16.gmra.mxu1 %v3678_v39  ;;  %v3749_v38 = vld [vmem:[%s4235_s21 + $0x1bc] ss:$36 sps:$4 sm:$0xff]   ;;  %v3751_v39 = vld [vmem:[%s4235_s21 + $0x2d0] ss:$36 sps:$4 sm:$0xff]  }
  0x81   : > { %3128 = vmatpush3.bf16.msra.mxu1 %v3681_v41  ;;  %1766 = vmatprep.mubr.bf16.mxu0 %v3685_v44  ;;  %v3799_v41 = vld [vmem:[#allocation5 + $0x1c8] sm:$0xff]  }
  0x82   : > { %3129 = vmatprep.subr.bf16.mxu1 %v3683_v42  ;;  %1862 = vmatprep.mubr.bf16.mxu1 %v3687_v45  ;;  %v3800_v42 = vld [vmem:[#allocation5 + $0x188] sm:$0xff]   ;;  %v3759_v45 = vld [vmem:[%s4235_s21 + $0x318] ss:$36 sps:$4 sm:$0xff]  }
  0x83   : > { %3239 = vmatprep.subr.bf16.mxu0 %v3721_v0  ;;  %v3757_v44 = vld [vmem:[%s4235_s21 + $0x204] ss:$36 sps:$4 sm:$0xff]  }
  0x84   : > { %3240 = vmatpush3.bf16.msra.mxu0 %v3722_v2  ;;  %v3783_v0 = vld [vmem:[%s4235_s21 + $0xa0] ss:$36 sps:$4 sm:$0xff]   ;;  %v3789_v2 = vld [vmem:[%s4235_s21 + $0xec] ss:$36 sps:$4 sm:$0xff]  }
  0x85   : > { %3130 = vmatpush3.bf16.msra.mxu1 %v3684_v47  ;;  %3241 = vmatprep.subr.bf16.mxu0 %v3735_v8  ;;  %v3814_v47 = vld [vmem:[#allocation5 + $0x1c0] sm:$0xff]   ;;  %v3795_v8 = vld [vmem:[%s4235_s21 + $0x134] ss:$36 sps:$4 sm:$0xff]  }
  0x86   : > { %3131 = vmatprep.subr.bf16.mxu1 %v3691_v48  ;;  %v3815_v48 = vld [vmem:[#allocation5 + $0x180] sm:$0xff]  }
  0x88   : > { %1767 = vmatmul.mubr.bf16.gmra.mxu0 %v3689_v49  ;;  %1863 = vmatmul.mubr.bf16.gmra.mxu1 %v3690_v50  ;;  %v3763_v49 = vld [vmem:[%s4235_s21 + $0x24c] ss:$36 sps:$4 sm:$0xff]   ;;  %v3767_v50 = vld [vmem:[%s4235_s21 + $0x14] ss:$36 sps:$4 sm:$0xff]  }
  0x89   : > { %3132 = vmatpush3.bf16.msra.mxu1 %v3692_v51  ;;  %1774 = vmatprep.mubr.bf16.mxu0 %v3697_v53  ;;  %v3765_v51 = vld [vmem:[%s4235_s21 + $0x10] ss:$36 sps:$4 sm:$0xff]  }
  0x8a   : > { %3133 = vmatprep.subr.bf16.mxu1 %v3693_v52  ;;  %1903 = vmatprep.mubr.bf16.mxu1 %v3701_v54  ;;  %v3768_v52 = vld [vmem:[%s4235_s21 + $0x248] ss:$36 sps:$4 sm:$0xff]   ;;  %v3772_v53 = vld [vmem:[%s4235_s21 + $0x294] ss:$36 sps:$4 sm:$0xff]   ;;  %v3774_v54 = vld [vmem:[%s4235_s21 + $0x5c] ss:$36 sps:$4 sm:$0xff]  }
  0x8b   : > { %3242 = vmatpush3.bf16.msra.mxu0 %v3737_v10  ;;  %v3797_v10 = vld [vmem:[%s4235_s21 + $0x368] ss:$36 sps:$4 sm:$0xff]  }
  0x8c   : > { %3243 = vmatprep.subr.bf16.mxu0 %v3745_v15  ;;  %v3807_v15 = vld [vmem:[%s4235_s21 + $0x178] ss:$36 sps:$4 sm:$0xff]  }
  0x8d   : > { %3134 = vmatpush3.bf16.msra.mxu1 %v3695_v57  ;;  %v3776_v57 = vld [vmem:[%s4235_s21 + $0x290] ss:$36 sps:$4 sm:$0xff]  }
  0x8e   : > { %3343 = vmatprep.subr.bf16.mxu1 %v3703_v60  ;;  %v3780_v60 = vld [vmem:[%s4235_s21 + $0xa4] ss:$36 sps:$4 sm:$0xff]  }
  0x8f   : > { %3244 = vmatpush3.bf16.msra.mxu0 %v3746_v16  ;;  %v3808_v16 = vld [vmem:[%s4235_s21 + $0x3fc] ss:$36 sps:$4 sm:$0xff]  }
  0x90   : > { %1775 = vmatmul.mubr.bf16.gmra.mxu0 %v3702_v59  ;;  %1904 = vmatmul.mubr.bf16.vlgmr.msra.gmra.mxu1 %v3699_v58  ;;  %v3777_v58 = vld [vmem:[%s4235_s21 + $0x58] ss:$36 sps:$4 sm:$0xff]  }
  0x91   : > { %3344 = vmatpush3.bf16.msra.mxu1 %v3704_v61  ;;  %1782 = vmatprep.mubr.bf16.mxu0 %v3705_v62  ;;  %v3778_v59 = vld [vmem:[%s4235_s21 + $0x2dc] ss:$36 sps:$4 sm:$0xff]  }
  0x92   : > { %1911 = vmatprep.mubr.bf16.mxu1 %v3707_v63  ;;  %3345 = vmatprep.subr.bf16.mxu1 %v3719_v1  ;;  %v3816_v61 = vld [vmem:[#allocation5 + $0x220] sm:$0xff]   ;;  %v3829_v62 = vld [vmem:[#allocation5 + $0x218] sm:$0xff]  }
  0x93   : > { %3245 = vmatprep.subr.bf16.mxu0 %v3761_v24  ;;  %v3782_v63 = vld [vmem:[%s4235_s21 + $0x2d8] ss:$36 sps:$4 sm:$0xff]   ;;  %v3787_v1 = vld [vmem:[%s4235_s21 + $0x324] ss:$36 sps:$4 sm:$0xff]  }
  0x94   : > { %3246 = vmatpush3.bf16.msra.mxu0 %v3762_v25  ;;  %v3823_v24 = vld [vmem:[%s4235_s21 + $0x254] ss:$36 sps:$4 sm:$0xff]   ;;  %v3827_v25 = vld [vmem:[%s4235_s21 + $0x1c] ss:$36 sps:$4 sm:$0xff]  }
  0x95   : > { %3346 = vmatpush3.bf16.msra.mxu1 %v3720_v3  ;;  %3479 = vmatprep.subr.bf16.mxu0 %v3771_v29  ;;  %v3842_v3 = vld [vmem:[#allocation5 + $0x210] sm:$0xff]  }
  0x96   : > { %3347 = vmatprep.subr.bf16.mxu1 %v3736_v9  ;;  %v3868_v9 = vld [vmem:[#allocation5 + $0x200] sm:$0xff]  }
  0x98   : > { %1783 = vmatmul.mubr.bf16.gmra.mxu0 %v3709_v4  ;;  %1912 = vmatmul.mubr.bf16.gmra.mxu1 %v3710_v5  ;;  %v3791_v4 = vld [vmem:[%s4235_s21 + $0x320] ss:$36 sps:$4 sm:$0xff]   ;;  %v3792_v5 = vld [vmem:[%s4235_s21 + $0xe8] ss:$36 sps:$4 sm:$0xff]  }
  0x99   : > { %1790 = vmatprep.mubr.bf16.mxu0 %v3713_v6  ;;  %1919 = vmatprep.mubr.bf16.mxu1 %v3715_v7  ;;  %v3855_v6 = vld [vmem:[#allocation5 + $0x208] sm:$0xff]  }
  0x9a   : > { %3348 = vmatpush3.bf16.msra.mxu1 %v3738_v11  ;;  %v3793_v7 = vld [vmem:[%s4235_s21 + $0x36c] ss:$36 sps:$4 sm:$0xff]  }
  0x9b   : > { %3349 = vmatprep.subr.bf16.mxu1 %v3753_v18  ;;  %v3798_v11 = vld [vmem:[%s4235_s21 + $0x130] ss:$36 sps:$4 sm:$0xff]   ;;  %v3812_v18 = vld [vmem:[%s4235_s21 + $0x3f8] ss:$36 sps:$4 sm:$0xff]  }
  0x9e   : > { %3350 = vmatpush3.bf16.msra.mxu1 %v3754_v19  ;;  %v3813_v19 = vld [vmem:[%s4235_s21 + $0x1c0] ss:$36 sps:$4 sm:$0xff]  }
  0x9f   : > { %3351 = vmatprep.subr.bf16.mxu1 %v3769_v26  ;;  %v3825_v26 = vld [vmem:[%s4235_s21 + $0x18] ss:$36 sps:$4 sm:$0xff]  }
  0xa0   : > { %1791 = vmatmul.mubr.bf16.gmra.mxu0 %v3717_v12  ;;  %1920 = vmatmul.mubr.bf16.gmra.mxu1 %v3718_v13  ;;  %v3802_v12 = vld [vmem:[%s4235_s21 + $0x3b4] ss:$36 sps:$4 sm:$0xff]   ;;  %v3804_v13 = vld [vmem:[%s4235_s21 + $0x17c] ss:$36 sps:$4 sm:$0xff]  }
  0xa1   : > { %1798 = vmatprep.mubr.bf16.mxu0 %v3723_v14  ;;  %1927 = vmatprep.mubr.bf16.mxu1 %v3725_v17  ;;  %v3806_v14 = vld [vmem:[%s4235_s21 + $0x3b0] ss:$36 sps:$4 sm:$0xff]   ;;  %v3810_v17 = vld [vmem:[%s4235_s21 + $0x1c4] ss:$36 sps:$4 sm:$0xff]  }
  0xa2   : > { %3352 = vmatpush3.bf16.msra.mxu1 %v3770_v28  ;;  %v3830_v28 = vld [vmem:[%s4235_s21 + $0x29c] ss:$36 sps:$4 sm:$0xff]  }
  0xa3   : > { %3353 = vmatprep.subr.bf16.mxu1 %v3784_v33  ;;  %v3838_v33 = vld [vmem:[%s4235_s21 + $0xac] ss:$36 sps:$4 sm:$0xff]  }
  0xa6   : > { %3354 = vmatpush3.bf16.msra.mxu1 %v3785_v35  ;;  %v3841_v35 = vld [vmem:[%s4235_s21 + $0xa8] ss:$36 sps:$4 sm:$0xff]  }
  0xa7   : > { %3355 = vmatprep.subr.bf16.mxu1 %v3799_v41  ;;  %v3851_v41 = vld [vmem:[%s4235_s21 + $0x13c] ss:$36 sps:$4 sm:$0xff]  }
  0xa8   : > { %1799 = vmatmul.mubr.bf16.gmra.mxu0 %v3727_v20  ;;  %1928 = vmatmul.mubr.bf16.gmra.mxu1 %v3728_v21  ;;  %v3817_v20 = vld [vmem:[%s4235_s21 + $0x444] ss:$36 sps:$4 sm:$0xff]   ;;  %v3819_v21 = vld [vmem:[%s4235_s21 + $0x20c] ss:$36 sps:$4 sm:$0xff]  }
  0xa9   : > { %1806 = vmatprep.mubr.bf16.mxu0 %v3729_v22  ;;  %1935 = vmatprep.mubr.bf16.mxu1 %v3731_v23  ;;  %v3821_v22 = vld [vmem:[%s4235_s21 + $0x440] ss:$36 sps:$4 sm:$0xff]   ;;  %v3822_v23 = vld [vmem:[%s4235_s21 + $0x208] ss:$36 sps:$4 sm:$0xff]  }
  0xaa   : > { %3356 = vmatpush3.bf16.msra.mxu1 %v3800_v42  ;;  %v3853_v42 = vld [vmem:[%s4235_s21 + $0x370] ss:$36 sps:$4 sm:$0xff]  }
  0xab   : > { %3357 = vmatprep.subr.bf16.mxu1 %v3814_v47 }
  0xae   : > { %3358 = vmatpush3.bf16.msra.mxu1 %v3815_v48 }
  0xb0   : > { %1807 = vmatmul.mubr.bf16.gmra.mxu0 %v3733_v27  ;;  %1936 = vmatmul.mubr.bf16.gmra.mxu1 %v3734_v30  ;;  %v3828_v27 = vld [vmem:[%s4235_s21 + $0x250] ss:$36 sps:$4 sm:$0xff]   ;;  %v3834_v30 = vld [vmem:[%s4235_s21 + $0x298] ss:$36 sps:$4 sm:$0xff]  }
  0xb1   : > { %1814 = vmatprep.mubr.bf16.mxu0 %v3739_v31  ;;  %1943 = vmatprep.mubr.bf16.mxu1 %v3741_v32  ;;  %v3835_v31 = vld [vmem:[%s4235_s21 + $0x60] ss:$36 sps:$4 sm:$0xff]  }
  0xb2   : > { %v3836_v32 = vld [vmem:[%s4235_s21 + $0x2e4] ss:$36 sps:$4 sm:$0xff]  }
  0xb8   : > { %1815 = vmatmul.mubr.bf16.gmra.mxu0 %v3743_v34  ;;  %1944 = vmatmul.mubr.bf16.gmra.mxu1 %v3744_v36  ;;  %v3840_v34 = vld [vmem:[%s4235_s21 + $0x2e0] ss:$36 sps:$4 sm:$0xff]   ;;  %v3843_v36 = vld [vmem:[%s4235_s21 + $0x32c] ss:$36 sps:$4 sm:$0xff]  }
  0xb9   : > { %1822 = vmatprep.mubr.bf16.mxu0 %v3747_v37  ;;  %1951 = vmatprep.mubr.bf16.mxu1 %v3749_v38  ;;  %v3845_v37 = vld [vmem:[%s4235_s21 + $0xf4] ss:$36 sps:$4 sm:$0xff]   ;;  %v3847_v38 = vld [vmem:[%s4235_s21 + $0x328] ss:$36 sps:$4 sm:$0xff]  }
  0xc0   : > { %1823 = vmatmul.mubr.bf16.gmra.mxu0 %v3751_v39  ;;  %1952 = vmatmul.mubr.bf16.gmra.mxu1 %v3752_v40  ;;  %v3848_v39 = vld [vmem:[%s4235_s21 + $0xf0] ss:$36 sps:$4 sm:$0xff]  }
  0xc1   : > { %1830 = vmatprep.mubr.bf16.mxu0 %v3755_v43  ;;  %1959 = vmatprep.mubr.bf16.mxu1 %v3757_v44  ;;  %v3849_v40 = vld [vmem:[%s4235_s21 + $0x374] ss:$36 sps:$4 sm:$0xff]   ;;  %v3856_v44 = vld [vmem:[%s4235_s21 + $0x3bc] ss:$36 sps:$4 sm:$0xff]  }
  0xc2   : > { %v3854_v43 = vld [vmem:[%s4235_s21 + $0x138] ss:$36 sps:$4 sm:$0xff]  }
  0xc8   : > { %1831 = vmatmul.mubr.bf16.gmra.mxu0 %v3759_v45  ;;  %1960 = vmatmul.mubr.bf16.gmra.mxu1 %v3760_v46  ;;  %v3858_v45 = vld [vmem:[%s4235_s21 + $0x184] ss:$36 sps:$4 sm:$0xff]  }
  0xc9   : > { %1967 = vmatprep.mubr.bf16.mxu1 %v3763_v49  ;;  %2064 = vmatprep.mubr.bf16.mxu0 %v3767_v50 }
  0xd0   : > { %1968 = vmatmul.mubr.bf16.gmra.mxu1 %v3768_v52  ;;  %2065 = vmatmul.mubr.bf16.vlgmr.msra.gmra.mxu0 %v3765_v51 }
  0xd1   : > { %3480 = vmatpush3.bf16.msra.mxu0 %v3771_v29  ;;  %1975 = vmatprep.mubr.bf16.mxu1 %v3772_v53  ;;  %v3832_v29 = vld [vmem:[%s4235_s21 + $0x64] ss:$36 sps:$4 sm:$0xff]  }
  0xd2   : > { %2072 = vmatprep.mubr.bf16.mxu0 %v3774_v54  ;;  %3481 = vmatprep.subr.bf16.mxu0 %v3786_v55  ;;  %v3860_v54 = vld [vmem:[%s4235_s21 + $0x3b8] ss:$36 sps:$4 sm:$0xff]  }
  0xd5   : > { %3482 = vmatpush3.bf16.msra.mxu0 %v3786_v55  ;;  %v3861_v55 = vld [vmem:[%s4235_s21 + $0x180] ss:$36 sps:$4 sm:$0xff]  }
  0xd6   : > { %3483 = vmatprep.subr.bf16.mxu0 %v3801_v56 }
  0xd8   : > { %1976 = vmatmul.mubr.bf16.gmra.mxu1 %v3776_v57  ;;  %2073 = vmatmul.mubr.bf16.gmra.mxu0 %v3777_v58  ;;  %v3864_v57 = vld [vmem:[%s4235_s21 + $0x1cc] ss:$36 sps:$4 sm:$0xff]  }
  0xd9   : > { %1983 = vmatprep.mubr.bf16.mxu1 %v3778_v59  ;;  %2080 = vmatprep.mubr.bf16.mxu0 %v3780_v60 }
  0xda   : > { %3484 = vmatpush3.bf16.msra.mxu0 %v3801_v56  ;;  %v3862_v56 = vld [vmem:[%s4235_s21 + $0x404] ss:$36 sps:$4 sm:$0xff]  }
  0xdb   : > { %3485 = vmatprep.subr.bf16.mxu0 %v3816_v61 }
  0xde   : > { %3486 = vmatpush3.bf16.msra.mxu0 %v3816_v61 }
  0xdf   : > { %3487 = vmatprep.subr.bf16.mxu0 %v3829_v62 }
  0xe0   : > { %1984 = vmatmul.mubr.bf16.gmra.mxu1 %v3782_v63  ;;  %2081 = vmatmul.mubr.bf16.gmra.mxu0 %v3783_v0 }
  0xe1   : > { %1991 = vmatprep.mubr.bf16.mxu1 %v3787_v1  ;;  %2088 = vmatprep.mubr.bf16.mxu0 %v3789_v2 }
  0xe2   : > { %3488 = vmatpush3.bf16.msra.mxu0 %v3829_v62 }
  0xe3   : > { %3489 = vmatprep.subr.bf16.mxu0 %v3842_v3 }
  0xe6   : > { %3490 = vmatpush3.bf16.msra.mxu0 %v3842_v3 }
  0xe7   : > { %3491 = vmatprep.subr.bf16.mxu0 %v3855_v6 }
  0xe8   : > { %1992 = vmatmul.mubr.bf16.gmra.mxu1 %v3791_v4  ;;  %2089 = vmatmul.mubr.bf16.gmra.mxu0 %v3792_v5 }
  0xe9   : > { %1999 = vmatprep.mubr.bf16.mxu1 %v3793_v7  ;;  %2096 = vmatprep.mubr.bf16.mxu0 %v3795_v8  ;;  %v3867_v7 = vld [vmem:[%s4235_s21 + $0x1c8] ss:$36 sps:$4 sm:$0xff]  }
  0xea   : > { %3492 = vmatpush3.bf16.msra.mxu0 %v3855_v6  ;;  %v3866_v6 = vld [vmem:[%s4235_s21 + $0x400] ss:$36 sps:$4 sm:$0xff]   ;;  %v3869_v8 = vld [vmem:[%s4235_s21 + $0x44c] ss:$36 sps:$4 sm:$0xff]  }
  0xeb   : > { %3493 = vmatprep.subr.bf16.mxu0 %v3868_v9 }
  0xee   : > { %3494 = vmatpush3.bf16.msra.mxu0 %v3868_v9  ;;  %v3871_v9 = vld [vmem:[%s4235_s21 + $0x214] ss:$36 sps:$4 sm:$0xff]  }
  0xf0   : > { %2000 = vmatmul.mubr.bf16.gmra.mxu1 %v3797_v10  ;;  %2097 = vmatmul.mubr.bf16.gmra.mxu0 %v3798_v11 }
  0xf1   : > { %2007 = vmatprep.mubr.bf16.mxu1 %v3802_v12  ;;  %2104 = vmatprep.mubr.bf16.mxu0 %v3804_v13 }
  0xf8   : > { %2008 = vmatmul.mubr.bf16.gmra.mxu1 %v3806_v14  ;;  %2105 = vmatmul.mubr.bf16.gmra.mxu0 %v3807_v15 }
  0xf9   : > { %2015 = vmatprep.mubr.bf16.mxu1 %v3808_v16  ;;  %2112 = vmatprep.mubr.bf16.mxu0 %v3810_v17 }
 0x100   : > { %2016 = vmatmul.mubr.bf16.gmra.mxu1 %v3812_v18  ;;  %2113 = vmatmul.mubr.bf16.gmra.mxu0 %v3813_v19 }
 0x101   : > { %2023 = vmatprep.mubr.bf16.mxu1 %v3817_v20  ;;  %2120 = vmatprep.mubr.bf16.mxu0 %v3819_v21 }
 0x108   : > { %2024 = vmatmul.mubr.bf16.gmra.mxu1 %v3821_v22  ;;  %2121 = vmatmul.mubr.bf16.gmra.mxu0 %v3822_v23  ;;  %v3873_v22 = vld [vmem:[%s4235_s21 + $0x448] ss:$36 sps:$4 sm:$0xff]   ;;  %v3874_v23 = vld [vmem:[%s4235_s21 + $0x210] ss:$36 sps:$4 sm:$0xff]  }
 0x109   : > { %2128 = vmatprep.mubr.bf16.mxu0 %v3823_v24  ;;  %2225 = vmatprep.mubr.bf16.mxu1 %v3827_v25  ;;  %v3877_v24 = vld [vmem:[%s4235_s21 + $0x25c] ss:$36 sps:$4 sm:$0xff]  }
 0x10a   : > { %v3878_v25 = vld [vmem:[%s4235_s21 + $0x20] ss:$36 sps:$4 sm:$0xff]  }
 0x110   : > { %2129 = vmatmul.mubr.bf16.gmra.mxu0 %v3828_v27  ;;  %2226 = vmatmul.mubr.bf16.vlgmr.msra.gmra.mxu1 %v3825_v26 }
 0x111   : > { %2136 = vmatprep.mubr.bf16.mxu0 %v3830_v28  ;;  %2233 = vmatprep.mubr.bf16.mxu1 %v3832_v29 }
 0x118   : > { %2137 = vmatmul.mubr.bf16.gmra.mxu0 %v3834_v30  ;;  %2234 = vmatmul.mubr.bf16.gmra.mxu1 %v3835_v31 }
 0x119   : > { %2144 = vmatprep.mubr.bf16.mxu0 %v3836_v32  ;;  %2241 = vmatprep.mubr.bf16.mxu1 %v3838_v33 }
 0x120   : > { %2145 = vmatmul.mubr.bf16.gmra.mxu0 %v3840_v34  ;;  %2242 = vmatmul.mubr.bf16.gmra.mxu1 %v3841_v35 }
 0x121   : > { %2152 = vmatprep.mubr.bf16.mxu0 %v3843_v36  ;;  %2249 = vmatprep.mubr.bf16.mxu1 %v3845_v37 }
 0x128   : > { %2153 = vmatmul.mubr.bf16.gmra.mxu0 %v3847_v38  ;;  %2250 = vmatmul.mubr.bf16.gmra.mxu1 %v3848_v39  ;;  %v3875_v38 = vld [vmem:[%s4235_s21 + $0x258] ss:$36 sps:$4 sm:$0xff]   ;;  %v3879_v39 = vld [vmem:[%s4235_s21 + $0x68] ss:$36 sps:$4 sm:$0xff]  }
 0x129   : > { %2160 = vmatprep.mubr.bf16.mxu0 %v3849_v40  ;;  %2257 = vmatprep.mubr.bf16.mxu1 %v3851_v41  ;;  %v3882_v40 = vld [vmem:[%s4235_s21 + $0x2a4] ss:$36 sps:$4 sm:$0xff]   ;;  %v3883_v41 = vld [vmem:[%s4235_s21 + $0xb0] ss:$36 sps:$4 sm:$0xff]  }
 0x130   : > { %v3023_v46 = vpop.f32.mrf.mxu0  ;;  %v3095_v47 = vpop.f32.mrf.mxu1  ;;  %2161 = vmatmul.mubr.bf16.gmra.mxu0 %v3853_v42  ;;  %2258 = vmatmul.mubr.bf16.gmra.mxu1 %v3854_v43 }
 0x131   : > { %2168 = vmatprep.mubr.bf16.mxu0 %v3856_v44  ;;  %2265 = vmatprep.mubr.bf16.mxu1 %v3858_v45 }
 0x132   : > { %v3024_v48 = vpop.f32.mrf.mxu0  ;;  %v3096_v49 = vpop.f32.mrf.mxu1 }
 0x133   : > { %v4347_v50 = vadd.f32 %v3024_v48, %v3023_v46  ;;  %v4349_v51 = vadd.f32 %v3096_v49, %v3095_v47 }
 0x134   : > { %v3026_v52 = vpop.f32.mrf.mxu0  ;;  %v3098_v53 = vpop.f32.mrf.mxu1 }
 0x136   : > { %v3027_v58 = vpop.f32.mrf.mxu0  ;;  %v3099_v59 = vpop.f32.mrf.mxu1 }
 0x137   : > { %v4355_v60 = vadd.f32 %v3027_v58, %v3026_v52  ;;  %v4357_v61 = vadd.f32 %v3099_v59, %v3098_v53  ;;  %v3887_v59 = vld [vmem:[%s4235_s21 + $0x2ec] ss:$36 sps:$4 sm:$0xff]  }
 0x138   : > { %v3029_v62 = vpop.f32.mrf.mxu0  ;;  %v3101_v63 = vpop.f32.mrf.mxu1  ;;  %2169 = vmatmul.mubr.bf16.gmra.mxu0 %v3860_v54  ;;  %2266 = vmatmul.mubr.bf16.gmra.mxu1 %v3861_v55 }
 0x139   : > { %2176 = vmatprep.mubr.bf16.mxu0 %v3862_v56  ;;  %2273 = vmatprep.mubr.bf16.mxu1 %v3864_v57  ;;  %v3880_v56 = vld [vmem:[%s4235_s21 + $0x2a0] ss:$36 sps:$4 sm:$0xff]   ;;  %v3884_v57 = vld [vmem:[%s4235_s21 + $0xf8] ss:$36 sps:$4 sm:$0xff]  }
 0x13a   : > { %v3030_v0 = vpop.f32.mrf.mxu0  ;;  %v3102_v1 = vpop.f32.mrf.mxu1 }
 0x13b   : > { %v4359_v2 = vadd.f32 %v3030_v0, %v3029_v62  ;;  %v4361_v3 = vadd.f32 %v3102_v1, %v3101_v63  ;;  %v3888_v62 = vld [vmem:[%s4235_s21 + $0x140] ss:$36 sps:$4 sm:$0xff]  }
 0x13c   : > { %v3032_v4 = vpop.f32.mrf.mxu0  ;;  %v3104_v5 = vpop.f32.mrf.mxu1 }
 0x13e   : > { %v3033_v10 = vpop.f32.mrf.mxu0  ;;  %v3105_v11 = vpop.f32.mrf.mxu1 }
 0x13f   : > { %v4367_v12 = vadd.f32 %v3033_v10, %v3032_v4  ;;  %v4369_v13 = vadd.f32 %v3105_v11, %v3104_v5 }
 0x140   : > { %v3035_v14 = vpop.f32.mrf.mxu0  ;;  %v3107_v15 = vpop.f32.mrf.mxu1  ;;  %2177 = vmatmul.mubr.bf16.gmra.mxu0 %v3866_v6  ;;  %2274 = vmatmul.mubr.bf16.gmra.mxu1 %v3867_v7 }
 0x141   : > { %2184 = vmatprep.mubr.bf16.mxu0 %v3869_v8  ;;  %2281 = vmatprep.mubr.bf16.mxu1 %v3871_v9 }
 0x142   : > { %v3036_v16 = vpop.f32.mrf.mxu0  ;;  %v3108_v17 = vpop.f32.mrf.mxu1 }
 0x143   : > { %v4371_v18 = vadd.f32 %v3036_v16, %v3035_v14  ;;  %v4373_v19 = vadd.f32 %v3108_v17, %v3107_v15  ;;  %v3885_v15 = vld [vmem:[%s4235_s21 + $0x2e8] ss:$36 sps:$4 sm:$0xff]  }
 0x144   : > { %v3038_v20 = vpop.f32.mrf.mxu0  ;;  %v3110_v21 = vpop.f32.mrf.mxu1  ;;  %v3889_v16 = vld [vmem:[%s4235_s21 + $0x188] ss:$36 sps:$4 sm:$0xff]  }
 0x146   : > { %v3039_v26 = vpop.f32.mrf.mxu0  ;;  %v3111_v27 = vpop.f32.mrf.mxu1 }
 0x147   : > { %v4379_v28 = vadd.f32 %v3039_v26, %v3038_v20  ;;  %v4381_v29 = vadd.f32 %v3111_v27, %v3110_v21  ;;  %v3892_v20 = vld [vmem:[%s4235_s21 + $0x334] ss:$36 sps:$4 sm:$0xff]  }
 0x148   : > { %v3041_v30 = vpop.f32.mrf.mxu0  ;;  %v3113_v31 = vpop.f32.mrf.mxu1  ;;  %2185 = vmatmul.mubr.bf16.gmra.mxu0 %v3873_v22  ;;  %2282 = vmatmul.mubr.bf16.gmra.mxu1 %v3874_v23  ;;  %v3893_v21 = vld [vmem:[%s4235_s21 + $0x1d0] ss:$36 sps:$4 sm:$0xff]  }
 0x149   : > { %2289 = vmatprep.mubr.bf16.mxu1 %v3877_v24  ;;  %3495 = vmatprep.mubr.bf16.mxu0 %v3878_v25 }
 0x14a   : > { %v3042_v32 = vpop.f32.mrf.mxu0  ;;  %v3114_v33 = vpop.f32.mrf.mxu1 }
 0x14b   : > { %v4383_v34 = vadd.f32 %v3042_v32, %v3041_v30  ;;  %v4385_v35 = vadd.f32 %v3114_v33, %v3113_v31 }
 0x14c   : > { %v3044_v36 = vpop.f32.mrf.mxu0  ;;  %v3116_v37 = vpop.f32.mrf.mxu1 }
 0x14e   : > { %v3045_v42 = vpop.f32.mrf.mxu0  ;;  %v3117_v43 = vpop.f32.mrf.mxu1 }
 0x14f   : > { %v4391_v44 = vadd.f32 %v3045_v42, %v3044_v36  ;;  %v4393_v45 = vadd.f32 %v3117_v43, %v3116_v37  ;;  %v3890_v37 = vld [vmem:[%s4235_s21 + $0x330] ss:$36 sps:$4 sm:$0xff]  }
 0x150   : > { %v3047_v46 = vpop.f32.mrf.mxu0  ;;  %v3135_v47 = vpop.f32.mrf.mxu1  ;;  %2290 = vmatmul.mubr.bf16.gmra.mxu1 %v3875_v38  ;;  %3496 = vmatmul.mubr.bf16.vlgmr.msra.gmra.mxu0 %v3879_v39  ;;  %v3894_v38 = vld [vmem:[%s4235_s21 + $0x218] ss:$36 sps:$4 sm:$0xff]  }
 0x151   : > { %2297 = vmatprep.mubr.bf16.mxu1 %v3882_v40  ;;  %3499 = vmatprep.mubr.bf16.mxu0 %v3883_v41  ;;  %v3897_v40 = vld [vmem:[%s4235_s21 + $0x37c] ss:$36 sps:$4 sm:$0xff]  }
 0x152   : > { %v3048_v48 = vpop.f32.mrf.mxu0  ;;  %v3136_v49 = vpop.f32.mrf.mxu1  ;;  %v3898_v41 = vld [vmem:[%s4235_s21 + $0x260] ss:$36 sps:$4 sm:$0xff]  }
 0x153   : > { %v4395_v52 = vadd.f32 %v3048_v48, %v3047_v46  ;;  %v3137_v53 = vadd.f32 %v3136_v49, %v3135_v47 }
 0x154   : > { %v3050_v54 = vpop.f32.mrf.mxu0  ;;  %v3138_v55 = vpop.f32.mrf.mxu1 }
 0x155   : > { %v4400_v58 = vadd.f32 %v3137_v53, %v4347_v50 }
 0x156   : > { %v3051_v63 = vpop.f32.mrf.mxu0  ;;  %v3139_v0 = vpop.f32.mrf.mxu1 }
 0x157   : > { %v4404_v1 = vadd.f32 %v3051_v63, %v3050_v54  ;;  %v3140_v4 = vadd.f32 %v3139_v0, %v3138_v55  ;;  %v3902_v0 = vld [vmem:[%s4235_s21 + $0x3c4] ss:$36 sps:$4 sm:$0xff]  }
 0x158   : > { %v3053_v5 = vpop.f32.mrf.mxu0  ;;  %v3141_v6 = vpop.f32.mrf.mxu1  ;;  %2298 = vmatmul.mubr.bf16.gmra.mxu1 %v3880_v56  ;;  %3500 = vmatmul.mubr.bf16.gmra.mxu0 %v3884_v57 }
 0x159   : > { %v4407_v7 = vadd.f32 %v3140_v4, %v4355_v60  ;;  %2305 = vmatprep.mubr.bf16.mxu1 %v3887_v59  ;;  %3503 = vmatprep.mubr.bf16.mxu0 %v3888_v62  ;;  %v3895_v59 = vld [vmem:[%s4235_s21 + $0x378] ss:$36 sps:$4 sm:$0xff]   ;;  %v3899_v62 = vld [vmem:[%s4235_s21 + $0x2a8] ss:$36 sps:$4 sm:$0xff]   ;;  %v3903_v4 = vld [vmem:[%s4235_s21 + $0x2f0] ss:$36 sps:$4 sm:$0xff]  }
 0x15a   : > { %v3054_v50 = vpop.f32.mrf.mxu0  ;;  %v3142_v8 = vpop.f32.mrf.mxu1 }
 0x15b   : > { %v4409_v9 = vadd.f32 %v3054_v50, %v3053_v5  ;;  %v3143_v10 = vadd.f32 %v3142_v8, %v3141_v6 }
 0x15c   : > { %v3056_v11 = vpop.f32.mrf.mxu0  ;;  %v3144_v14 = vpop.f32.mrf.mxu1 }
 0x15d   : > { %v4414_v17 = vadd.f32 %v3143_v10, %v4359_v2 }
 0x15e   : > { %v3057_v22 = vpop.f32.mrf.mxu0  ;;  %v3145_v23 = vpop.f32.mrf.mxu1 }
 0x15f   : > { %v4418_v60 = vadd.f32 %v3057_v22, %v3056_v11  ;;  %v3146_v24 = vadd.f32 %v3145_v23, %v3144_v14  ;;  %v3900_v22 = vld [vmem:[%s4235_s21 + $0x3c0] ss:$36 sps:$4 sm:$0xff]   ;;  %v3904_v23 = vld [vmem:[%s4235_s21 + $0x338] ss:$36 sps:$4 sm:$0xff]  }
 0x160   : > { %v3059_v25 = vpop.f32.mrf.mxu0  ;;  %v3147_v26 = vpop.f32.mrf.mxu1  ;;  %2306 = vmatmul.mubr.bf16.gmra.mxu1 %v3885_v15  ;;  %3504 = vmatmul.mubr.bf16.gmra.mxu0 %v3889_v16 }
 0x161   : > { %v4421_v27 = vadd.f32 %v3146_v24, %v4367_v12  ;;  %2313 = vmatprep.mubr.bf16.mxu1 %v3892_v20  ;;  %3507 = vmatprep.mubr.bf16.mxu0 %v3893_v21 }
 0x162   : > { %v3060_v2 = vpop.f32.mrf.mxu0  ;;  %v3148_v30 = vpop.f32.mrf.mxu1 }
 0x163   : > { %v4423_v31 = vadd.f32 %v3060_v2, %v3059_v25  ;;  %v3149_v32 = vadd.f32 %v3148_v30, %v3147_v26  ;;  %v3907_v25 = vld [vmem:[%s4235_s21 + $0x40c] ss:$36 sps:$4 sm:$0xff]   ;;  %v3908_v26 = vld [vmem:[%s4235_s21 + $0x380] ss:$36 sps:$4 sm:$0xff]  }
 0x164   : > { %v3062_v33 = vpop.f32.mrf.mxu0  ;;  %v3150_v36 = vpop.f32.mrf.mxu1 }
 0x165   : > { %v4428_v39 = vadd.f32 %v3149_v32, %v4371_v18 }
 0x166   : > { %v3063_v42 = vpop.f32.mrf.mxu0  ;;  %v3151_v43 = vpop.f32.mrf.mxu1 }
 0x167   : > { %v4432_v12 = vadd.f32 %v3063_v42, %v3062_v33  ;;  %v3152_v46 = vadd.f32 %v3151_v43, %v3150_v36 }
 0x168   : > { %v3065_v47 = vpop.f32.mrf.mxu0  ;;  %v3153_v48 = vpop.f32.mrf.mxu1  ;;  %2314 = vmatmul.mubr.bf16.gmra.mxu1 %v3890_v37  ;;  %3508 = vmatmul.mubr.bf16.gmra.mxu0 %v3894_v38 }
 0x169   : > { %v4435_v49 = vadd.f32 %v3152_v46, %v4379_v28  ;;  %2321 = vmatprep.mubr.bf16.mxu1 %v3897_v40  ;;  %3511 = vmatprep.mubr.bf16.mxu0 %v3898_v41  ;;  %v3905_v46 = vld [vmem:[%s4235_s21 + $0x408] ss:$36 sps:$4 sm:$0xff]  }
 0x16a   : > { %v3066_v18 = vpop.f32.mrf.mxu0  ;;  %v3154_v53 = vpop.f32.mrf.mxu1 }
 0x16b   : > { %v4437_v54 = vadd.f32 %v3066_v18, %v3065_v47  ;;  %v3155_v55 = vadd.f32 %v3154_v53, %v3153_v48  ;;  %v3909_v47 = vld [vmem:[%s4235_s21 + $0x3c8] ss:$36 sps:$4 sm:$0xff]   ;;  %v3912_v18 = vld [vmem:[%s4235_s21 + $0x454] ss:$36 sps:$4 sm:$0xff]  }
 0x16c   : > { %v3068_v56 = vpop.f32.mrf.mxu0  ;;  %v3156_v57 = vpop.f32.mrf.mxu1  ;;  %v3913_v53 = vld [vmem:[%s4235_s21 + $0x410] ss:$36 sps:$4 sm:$0xff]  }
 0x16d   : > { %v4442_v63 = vadd.f32 %v3155_v55, %v4383_v34 }
 0x16e   : > { %v3069_v5 = vpop.f32.mrf.mxu0  ;;  %v3157_v6 = vpop.f32.mrf.mxu1 }
 0x16f   : > { %v4446_v28 = vadd.f32 %v3069_v5, %v3068_v56  ;;  %v3158_v50 = vadd.f32 %v3157_v6, %v3156_v57 }
 0x170   : > { %v3071_v8 = vpop.f32.mrf.mxu0  ;;  %v3159_v10 = vpop.f32.mrf.mxu1  ;;  %2322 = vmatmul.mubr.bf16.gmra.mxu1 %v3895_v59  ;;  %3512 = vmatmul.mubr.bf16.gmra.mxu0 %v3899_v62 }
 0x171   : > { %v4449_v11 = vadd.f32 %v3158_v50, %v4391_v44  ;;  %2329 = vmatprep.mubr.bf16.mxu1 %v3902_v0  ;;  %3515 = vmatprep.mubr.bf16.mxu0 %v3903_v4 }
 0x172   : > { %v3072_v34 = vpop.f32.mrf.mxu0  ;;  %v3160_v14 = vpop.f32.mrf.mxu1 }
 0x173   : > { %v4451_v15 = vadd.f32 %v3072_v34, %v3071_v8  ;;  %v3161_v16 = vadd.f32 %v3160_v14, %v3159_v10  ;;  %v3910_v10 = vld [vmem:[%s4235_s21 + $0x450] ss:$36 sps:$4 sm:$0xff]   ;;  %v3914_v34 = vld [vmem:[%s4235_s21 + $0x458] ss:$36 sps:$4 sm:$0xff]  }
 0x174   : > { %v3074_v20 = vpop.f32.mrf.mxu0  ;;  %v3162_v21 = vpop.f32.mrf.mxu1 }
 0x175   : > { %v4456_v24 = vadd.f32 %v3161_v16, %v4395_v52 }
 0x176   : > { %v3075_v2 = vpop.f32.mrf.mxu0  ;;  %v3163_v30 = vpop.f32.mrf.mxu1 }
 0x177   : > { %v4460_v44 = vadd.f32 %v3075_v2, %v3074_v20  ;;  %v3164_v32 = vadd.f32 %v3163_v30, %v3162_v21 }
 0x178   : > { %v3077_v33 = vpop.f32.mrf.mxu0  ;;  %v3165_v36 = vpop.f32.mrf.mxu1  ;;  %2330 = vmatmul.mubr.bf16.gmra.mxu1 %v3900_v22  ;;  %3516 = vmatmul.mubr.bf16.gmra.mxu0 %v3904_v23 }
 0x179   : > { %v4463_v37 = vadd.f32 %v3164_v32, %v4404_v1  ;;  %2337 = vmatprep.mubr.bf16.mxu1 %v3907_v25  ;;  %3519 = vmatprep.mubr.bf16.mxu0 %v3908_v26 }
 0x17a   : > { %v3078_v52 = vpop.f32.mrf.mxu0  ;;  %v3166_v38 = vpop.f32.mrf.mxu1 }
 0x17b   : > { %v4465_v40 = vadd.f32 %v3078_v52, %v3077_v33  ;;  %v3167_v41 = vadd.f32 %v3166_v38, %v3165_v36 }
 0x17c   : > { %v3080_v42 = vpop.f32.mrf.mxu0  ;;  %v3168_v43 = vpop.f32.mrf.mxu1 }
 0x17d   : > { %v4470_v48 = vadd.f32 %v3167_v41, %v4409_v9 }
 0x17e   : > { %v3081_v55 = vpop.f32.mrf.mxu0  ;;  %v3169_v56 = vpop.f32.mrf.mxu1 }
 0x17f   : > { %v4474_v1 = vadd.f32 %v3081_v55, %v3080_v42  ;;  %v3170_v57 = vadd.f32 %v3169_v56, %v3168_v43 }
 0x180   : > { %v3083_v59 = vpop.f32.mrf.mxu0  ;;  %v3171_v62 = vpop.f32.mrf.mxu1  ;;  %2338 = vmatmul.mubr.bf16.gmra.mxu1 %v3905_v46  ;;  %3520 = vmatmul.mubr.bf16.gmra.mxu0 %v3909_v47 }
 0x181   : > { %v4477_v0 = vadd.f32 %v3170_v57, %v4418_v60  ;;  %2345 = vmatprep.mubr.bf16.mxu1 %v3912_v18  ;;  %3523 = vmatprep.mubr.bf16.mxu0 %v3913_v53 }
 0x182   : > { %v3084_v9 = vpop.f32.mrf.mxu0  ;;  %v3172_v4 = vpop.f32.mrf.mxu1 }
 0x183   : > { %v4479_v5 = vadd.f32 %v3084_v9, %v3083_v59  ;;  %v3173_v6 = vadd.f32 %v3172_v4, %v3171_v62 }
 0x184   : > { %v3086_v50 = vpop.f32.mrf.mxu0  ;;  %v3174_v8 = vpop.f32.mrf.mxu1 }
 0x185   : > { %v4484_v14 = vadd.f32 %v3173_v6, %v4423_v31 }
 0x186   : > { %v3087_v16 = vpop.f32.mrf.mxu0  ;;  %v3175_v20 = vpop.f32.mrf.mxu1 }
 0x187   : > { %v4486_v21 = vadd.f32 %v3087_v16, %v3086_v50  ;;  %v3176_v60 = vadd.f32 %v3175_v20, %v3174_v8 }
 0x188   : > { %v3089_v22 = vpop.f32.mrf.mxu0  ;;  %v3177_v23 = vpop.f32.mrf.mxu1  ;;  %2346 = vmatmul.mubr.bf16.gmra.mxu1 %v3910_v10  ;;  %3524 = vmatmul.mubr.bf16.gmra.mxu0 %v3914_v34 }
 0x189   : > { %v4489_v25 = vadd.f32 %v3176_v60, %v4432_v12 }
 0x18a   : > { %v3090_v26 = vpop.f32.mrf.mxu0  ;;  %v3178_v2 = vpop.f32.mrf.mxu1 }
 0x18b   : > { %v4491_v30 = vadd.f32 %v3090_v26, %v3089_v22  ;;  %v3179_v32 = vadd.f32 %v3178_v2, %v3177_v23 }
 0x18c   : > { %v3092_v33 = vpop.f32.mrf.mxu0  ;;  %v3180_v31 = vpop.f32.mrf.mxu1 }
 0x18d   : > { %v4494_v36 = vadd.f32 %v3179_v32, %v4437_v54 }
 0x18e   : > { %v3093_v52 = vpop.f32.mrf.mxu0  ;;  %v3181_v38 = vpop.f32.mrf.mxu1 }
 0x18f   : > { %v4496_v41 = vadd.f32 %v3093_v52, %v3092_v33  ;;  %v3182_v42 = vadd.f32 %v3181_v38, %v3180_v31 }
 0x190   : > { %v3183_v43 = vpop.f32.mrf.mxu1  ;;  %v3247_v46 = vpop.f32.mrf.mxu0 }
 0x191   : > { %v4499_v12 = vadd.f32 %v3182_v42, %v4446_v28 }
 0x192   : > { %v3184_v47 = vpop.f32.mrf.mxu1  ;;  %v3248_v18 = vpop.f32.mrf.mxu0 }
 0x193   : > { %v3185_v53 = vadd.f32 %v3184_v47, %v3183_v43  ;;  %v3249_v55 = vadd.f32 %v3248_v18, %v3247_v46 }
 0x194   : > { %v3186_v56 = vpop.f32.mrf.mxu1  ;;  %v3250_v57 = vpop.f32.mrf.mxu0 }
 0x195   : > { %v4502_v59 = vadd.f32 %v3185_v53, %v4451_v15  ;;  %v4505_v54 = vadd.f32 %v3249_v55, %v4400_v58 }
 0x196   : > { %v3187_v62 = vpop.f32.mrf.mxu1  ;;  %v3251_v9 = vpop.f32.mrf.mxu0 }
 0x197   : > { %v3188_v4 = vadd.f32 %v3187_v62, %v3186_v56  ;;  %v3252_v6 = vadd.f32 %v3251_v9, %v3250_v57 }
 0x198   : > { %v3189_v50 = vpop.f32.mrf.mxu1  ;;  %v3253_v8 = vpop.f32.mrf.mxu0 }
 0x199   : > { %v4508_v28 = vadd.f32 %v3188_v4, %v4460_v44  ;;  %v4511_v10 = vadd.f32 %v3252_v6, %v4407_v7 }
 0x19a   : > { %v3190_v34 = vpop.f32.mrf.mxu1  ;;  %v3254_v16 = vpop.f32.mrf.mxu0 }
 0x19b   : > { %v3191_v20 = vadd.f32 %v3190_v34, %v3189_v50  ;;  %v3255_v15 = vadd.f32 %v3254_v16, %v3253_v8 }
 0x19c   : > { %v3192_v60 = vpop.f32.mrf.mxu1  ;;  %v3256_v22 = vpop.f32.mrf.mxu0 }
 0x19d   : > { %v4514_v58 = vadd.f32 %v3191_v20, %v4465_v40  ;;  %v4517_v23 = vadd.f32 %v3255_v15, %v4414_v17 }
 0x19e   : > { %v3193_v26 = vpop.f32.mrf.mxu1  ;;  %v3257_v2 = vpop.f32.mrf.mxu0 }
 0x19f   : > { %v3194_v32 = vadd.f32 %v3193_v26, %v3192_v60  ;;  %v3258_v44 = vadd.f32 %v3257_v2, %v3256_v22 }
 0x1a0   : > { %v3195_v33 = vpop.f32.mrf.mxu1  ;;  %v3259_v31 = vpop.f32.mrf.mxu0 }
 0x1a1   : > { %v4520_v7 = vadd.f32 %v3194_v32, %v4474_v1  ;;  %v4523_v52 = vadd.f32 %v3258_v44, %v4421_v27 }
 0x1a2   : > { %v3196_v38 = vpop.f32.mrf.mxu1  ;;  %v3260_v42 = vpop.f32.mrf.mxu0 }
 0x1a3   : > { %v3197_v43 = vadd.f32 %v3196_v38, %v3195_v33  ;;  %v3261_v40 = vadd.f32 %v3260_v42, %v3259_v31 }
 0x1a4   : > { %v3198_v46 = vpop.f32.mrf.mxu1  ;;  %v3262_v47 = vpop.f32.mrf.mxu0 }
 0x1a5   : > { %v4526_v17 = vadd.f32 %v3197_v43, %v4479_v5  ;;  %v4529_v18 = vadd.f32 %v3261_v40, %v4428_v39 }
 0x1a6   : > { %v3199_v53 = vpop.f32.mrf.mxu1  ;;  %v3263_v55 = vpop.f32.mrf.mxu0 }
 0x1a7   : > { %v3200_v56 = vadd.f32 %v3199_v53, %v3198_v46  ;;  %v3264_v1 = vadd.f32 %v3263_v55, %v3262_v47 }
 0x1a8   : > { %v3201_v57 = vpop.f32.mrf.mxu1  ;;  %v3265_v62 = vpop.f32.mrf.mxu0 }
 0x1a9   : > { %v4532_v27 = vadd.f32 %v3200_v56, %v4486_v21  ;;  %v4535_v9 = vadd.f32 %v3264_v1, %v4435_v49 }
 0x1aa   : > { %v3202_v4 = vpop.f32.mrf.mxu1  ;;  %v3266_v6 = vpop.f32.mrf.mxu0 }
 0x1ab   : > { %v3203_v50 = vadd.f32 %v3202_v4, %v3201_v57  ;;  %v3267_v5 = vadd.f32 %v3266_v6, %v3265_v62 }
 0x1ac   : > { %v3204_v8 = vpop.f32.mrf.mxu1  ;;  %v3268_v34 = vpop.f32.mrf.mxu0 }
 0x1ad   : > { %v4538_v39 = vadd.f32 %v3203_v50, %v4491_v30  ;;  %v4541_v16 = vadd.f32 %v3267_v5, %v4442_v63 }
 0x1ae   : > { %v3205_v20 = vpop.f32.mrf.mxu1  ;;  %v3269_v15 = vpop.f32.mrf.mxu0 }
 0x1af   : > { %v3206_v60 = vadd.f32 %v3205_v20, %v3204_v8  ;;  %v3270_v21 = vadd.f32 %v3269_v15, %v3268_v34 }
 0x1b0   : > { %v3207_v22 = vpop.f32.mrf.mxu1  ;;  %v3271_v26 = vpop.f32.mrf.mxu0 }
 0x1b1   : > { %v4544_v49 = vadd.f32 %v3206_v60, %v4496_v41  ;;  %v4547_v2 = vadd.f32 %v3270_v21, %v4449_v11 }
 0x1b2   : > { %v3208_v32 = vpop.f32.mrf.mxu1  ;;  %v3272_v44 = vpop.f32.mrf.mxu0 }
 0x1b3   : > { %v3209_v33 = vadd.f32 %v3208_v32, %v3207_v22  ;;  %v3273_v30 = vadd.f32 %v3272_v44, %v3271_v26 }
 0x1b4   : > { %v3210_v31 = vpop.f32.mrf.mxu1  ;;  %v3274_v38 = vpop.f32.mrf.mxu0 }
 0x1b5   : > { %v4550_v63 = vadd.f32 %v3209_v33, %v4349_v51  ;;  %v4553_v42 = vadd.f32 %v3273_v30, %v4456_v24 }
 0x1b6   : > { %v3211_v43 = vpop.f32.mrf.mxu1  ;;  %v3275_v40 = vpop.f32.mrf.mxu0 }
 0x1b7   : > { %v3212_v46 = vadd.f32 %v3211_v43, %v3210_v31  ;;  %v3276_v41 = vadd.f32 %v3275_v40, %v3274_v38 }
 0x1b8   : > { %v3213_v47 = vpop.f32.mrf.mxu1  ;;  %v3277_v53 = vpop.f32.mrf.mxu0 }
 0x1b9   : > { %v4556_v11 = vadd.f32 %v3212_v46, %v4357_v61  ;;  %v4559_v55 = vadd.f32 %v3276_v41, %v4463_v37 }
 0x1ba   : > { %v3214_v56 = vpop.f32.mrf.mxu1  ;;  %v3278_v1 = vpop.f32.mrf.mxu0 }
 0x1bb   : > { %v3215_v57 = vadd.f32 %v3214_v56, %v3213_v47  ;;  %v3279_v51 = vadd.f32 %v3278_v1, %v3277_v53 }
 0x1bc   : > { %v3216_v62 = vpop.f32.mrf.mxu1  ;;  %v3280_v4 = vpop.f32.mrf.mxu0 }
 0x1bd   : > { %v4562_v24 = vadd.f32 %v3215_v57, %v4361_v3  ;;  %v4565_v6 = vadd.f32 %v3279_v51, %v4470_v48 }
 0x1be   : > { %v3217_v50 = vpop.f32.mrf.mxu1  ;;  %v3281_v5 = vpop.f32.mrf.mxu0 }
 0x1bf   : > { %v3218_v8 = vadd.f32 %v3217_v50, %v3216_v62  ;;  %v3282_v61 = vadd.f32 %v3281_v5, %v3280_v4 }
 0x1c0   : > { %v3219_v34 = vpop.f32.mrf.mxu1  ;;  %v3283_v20 = vpop.f32.mrf.mxu0 }
 0x1c1   : > { %v4568_v37 = vadd.f32 %v3218_v8, %v4369_v13  ;;  %v4571_v15 = vadd.f32 %v3282_v61, %v4477_v0 }
 0x1c2   : > { %v3220_v60 = vpop.f32.mrf.mxu1  ;;  %v3284_v21 = vpop.f32.mrf.mxu0 }
 0x1c3   : > { %v3221_v22 = vadd.f32 %v3220_v60, %v3219_v34  ;;  %v3285_v3 = vadd.f32 %v3284_v21, %v3283_v20 }
 0x1c4   : > { %v3222_v26 = vpop.f32.mrf.mxu1  ;;  %v3286_v32 = vpop.f32.mrf.mxu0 }
 0x1c5   : > { %v4574_v48 = vadd.f32 %v3221_v22, %v4373_v19  ;;  %v4577_v44 = vadd.f32 %v3285_v3, %v4484_v14 }
 0x1c6   : > { %v3223_v33 = vpop.f32.mrf.mxu1  ;;  %v3287_v30 = vpop.f32.mrf.mxu0 }
 0x1c7   : > { %v3224_v31 = vadd.f32 %v3223_v33, %v3222_v26  ;;  %v3288_v13 = vadd.f32 %v3287_v30, %v3286_v32 }
 0x1c8   : > { %v3225_v38 = vpop.f32.mrf.mxu1  ;;  %v3289_v43 = vpop.f32.mrf.mxu0 }
 0x1c9   : > { %v4580_v0 = vadd.f32 %v3224_v31, %v4381_v29  ;;  %v4583_v40 = vadd.f32 %v3288_v13, %v4489_v25 }
 0x1ca   : > { %v3226_v46 = vpop.f32.mrf.mxu1  ;;  %v3290_v41 = vpop.f32.mrf.mxu0 }
 0x1cb   : > { %v3227_v47 = vadd.f32 %v3226_v46, %v3225_v38  ;;  %v3291_v19 = vadd.f32 %v3290_v41, %v3289_v43 }
 0x1cc   : > { %v3228_v53 = vpop.f32.mrf.mxu1  ;;  %v3292_v56 = vpop.f32.mrf.mxu0 }
 0x1cd   : > { %v4586_v14 = vadd.f32 %v3227_v47, %v4385_v35  ;;  %v4589_v1 = vadd.f32 %v3291_v19, %v4494_v36 }
 0x1ce   : > { %v3229_v57 = vpop.f32.mrf.mxu1  ;;  %v3293_v51 = vpop.f32.mrf.mxu0 }
 0x1cf   : > { %v3230_v62 = vadd.f32 %v3229_v57, %v3228_v53  ;;  %v3294_v29 = vadd.f32 %v3293_v51, %v3292_v56 }
 0x1d0   : > { %v3295_v4 = vpop.f32.mrf.mxu0  ;;  %v4591_v50 = vpop.f32.mrf.mxu1 }
 0x1d1   : > { %v4594_v25 = vadd.f32 %v3230_v62, %v4393_v45  ;;  %v4597_v5 = vadd.f32 %v3294_v29, %v4499_v12 }
 0x1d2   : > { %v3296_v8 = vpop.f32.mrf.mxu0  ;;  %v4599_v61 = vpop.f32.mrf.mxu1 }
 0x1d3   : > { %v3297_v35 = vadd.f32 %v3296_v8, %v3295_v4 }
 0x1d4   : > { %v3298_v34 = vpop.f32.mrf.mxu0  ;;  %v4601_v36 = vpop.f32.mrf.mxu1 }
 0x1d5   : > { %v4604_v20 = vadd.f32 %v3297_v35, %v4502_v59 }
 0x1d6   : > { %v3299_v60 = vpop.f32.mrf.mxu0  ;;  %v4606_v21 = vpop.f32.mrf.mxu1 }
 0x1d7   : > { %4984 = vst [vmem:[#allocation12_spill] sm:$0xff] %v4604_v20  ;;  %v3300_v22 = vadd.f32 %v3299_v60, %v3298_v34  ;;  %v2515_v20 = vld [vmem:[#allocation7] sm:$0xff] }
 0x1d8   : > { %v3301_v3 = vpop.f32.mrf.mxu0  ;;  %v4608_v45 = vpop.f32.mrf.mxu1 }
 0x1d9   : > { %v4611_v12 = vadd.f32 %v3300_v22, %v4508_v28 }
 0x1da   : > { %v3302_v26 = vpop.f32.mrf.mxu0  ;;  %v4613_v32 = vpop.f32.mrf.mxu1 }
 0x1db   : > { %4985 = vst [vmem:[#allocation13_spill] sm:$0xff] %v4611_v12  ;;  %v3303_v33 = vadd.f32 %v3302_v26, %v3301_v3 }
 0x1dc   : > { %v3304_v30 = vpop.f32.mrf.mxu0  ;;  %v4615_v31 = vpop.f32.mrf.mxu1 }
 0x1dd   : > { %v4618_v59 = vadd.f32 %v3303_v33, %v4514_v58 }
 0x1de   : > { %v3305_v13 = vpop.f32.mrf.mxu0  ;;  %v4620_v38 = vpop.f32.mrf.mxu1 }
 0x1df   : > { %4986 = vst [vmem:[#allocation14_spill] sm:$0xff] %v4618_v59  ;;  %v3306_v43 = vadd.f32 %v3305_v13, %v3304_v30 }
 0x1e0   : > { %v3307_v46 = vpop.f32.mrf.mxu0  ;;  %v4622_v41 = vpop.f32.mrf.mxu1 }
 0x1e1   : > { %v4625_v28 = vadd.f32 %v3306_v43, %v4520_v7 }
 0x1e2   : > { %v3308_v47 = vpop.f32.mrf.mxu0  ;;  %v4627_v19 = vpop.f32.mrf.mxu1 }
 0x1e3   : > { %4987 = vst [vmem:[#allocation15_spill] sm:$0xff] %v4625_v28  ;;  %v3309_v53 = vadd.f32 %v3308_v47, %v3307_v46 }
 0x1e4   : > { %v3310_v56 = vpop.f32.mrf.mxu0  ;;  %v4629_v57 = vpop.f32.mrf.mxu1 }
 0x1e5   : > { %v4632_v58 = vadd.f32 %v3309_v53, %v4526_v17 }
 0x1e6   : > { %v3311_v51 = vpop.f32.mrf.mxu0  ;;  %v4634_v62 = vpop.f32.mrf.mxu1 }
 0x1e7   : > { %4988 = vst [vmem:[#allocation16_spill] sm:$0xff] %v4632_v58  ;;  %v3312_v29 = vadd.f32 %v3311_v51, %v3310_v56 }
 0x1e8   : > { %v3313_v4 = vpop.f32.mrf.mxu0  ;;  %v4636_v8 = vpop.f32.mrf.mxu1 }
 0x1e9   : > { %v4639_v7 = vadd.f32 %v3312_v29, %v4532_v27 }
 0x1ea   : > { %v3314_v35 = vpop.f32.mrf.mxu0  ;;  %v4641_v34 = vpop.f32.mrf.mxu1 }
 0x1eb   : > { %4989 = vst [vmem:[#allocation17_spill] sm:$0xff] %v4639_v7  ;;  %v3315_v60 = vadd.f32 %v3314_v35, %v3313_v4 }
 0x1ec   : > { %v3316_v22 = vpop.f32.mrf.mxu0  ;;  %v4643_v3 = vpop.f32.mrf.mxu1 }
 0x1ed   : > { %v4646_v17 = vadd.f32 %v3315_v60, %v4538_v39 }
 0x1ee   : > { %v3317_v26 = vpop.f32.mrf.mxu0  ;;  %v4648_v33 = vpop.f32.mrf.mxu1 }
 0x1ef   : > { %4990 = vst [vmem:[#allocation18_spill] sm:$0xff] %v4646_v17  ;;  %v3318_v30 = vadd.f32 %v3317_v26, %v3316_v22 }
 0x1f0   : > { %v3319_v13 = vpop.f32.mrf.mxu0  ;;  %v4650_v43 = vpop.f32.mrf.mxu1 }
 0x1f1   : > { %v4653_v27 = vadd.f32 %v3318_v30, %v4544_v49 }
 0x1f2   : > { %v3320_v46 = vpop.f32.mrf.mxu0  ;;  %v4655_v47 = vpop.f32.mrf.mxu1 }
 0x1f3   : > { %4991 = vst [vmem:[#allocation19_spill] sm:$0xff] %v4653_v27  ;;  %v3321_v53 = vadd.f32 %v3320_v46, %v3319_v13 }
 0x1f4   : > { %v3322_v56 = vpop.f32.mrf.mxu0  ;;  %v4657_v51 = vpop.f32.mrf.mxu1 }
 0x1f5   : > { %v4660_v39 = vadd.f32 %v3321_v53, %v4550_v63 }
 0x1f6   : > { %v3323_v29 = vpop.f32.mrf.mxu0  ;;  %v4662_v4 = vpop.f32.mrf.mxu1 }
 0x1f7   : > { %4992 = vst [vmem:[#allocation20_spill] sm:$0xff] %v4660_v39  ;;  %v3324_v35 = vadd.f32 %v3323_v29, %v3322_v56 }
 0x1f8   : > { %v3325_v60 = vpop.f32.mrf.mxu0  ;;  %v4664_v22 = vpop.f32.mrf.mxu1 }
 0x1f9   : > { %v4667_v49 = vadd.f32 %v3324_v35, %v4556_v11 }
 0x1fa   : > { %v3326_v26 = vpop.f32.mrf.mxu0  ;;  %v4669_v30 = vpop.f32.mrf.mxu1 }
 0x1fb   : > { %4993 = vst [vmem:[#allocation21_spill] sm:$0xff] %v4667_v49  ;;  %v3327_v13 = vadd.f32 %v3326_v26, %v3325_v60  ;;  %v2516_v26 = vlaneseq }
 0x1fc   : > { %v3328_v46 = vpop.f32.mrf.mxu0  ;;  %v4671_v7 = vpop.f32.mrf.mxu1 }
 0x1fd   : > { %v4674_v63 = vadd.f32 %v3327_v13, %v4562_v24 }
 0x1fe   : > { %v3329_v53 = vpop.f32.mrf.mxu0  ;;  %v4676_v39 = vpop.f32.mrf.mxu1 }
 0x1ff   : > { %4994 = vst [vmem:[#allocation22_spill] sm:$0xff] %v4674_v63  ;;  %v3330_v56 = vadd.f32 %v3329_v53, %v3328_v46  ;;  %v2517_v53 = vshrl.u32 %v2516_v26, 7 }
 0x200   : > { %v3331_v29 = vpop.f32.mrf.mxu0  ;;  %v4678_v27 = vpop.f32.mrf.mxu1 }
 0x201   : > { %v4681_v11 = vadd.f32 %v3330_v56, %v4568_v37 }
 0x202   : > { %v3332_v35 = vpop.f32.mrf.mxu0  ;;  %v4683_v49 = vpop.f32.mrf.mxu1 }
 0x203   : > { %4995 = vst [vmem:[#allocation23_spill] sm:$0xff] %v4681_v11  ;;  %v3333_v60 = vadd.f32 %v3332_v35, %v3331_v29  ;;  %v3367_v35 = vadd.f32 %v4613_v32, %v4608_v45  ;;  %v3370_v45 = vadd.f32 %v4620_v38, %v4615_v31 }
 0x204   : > { %v3334_v58 = vpop.f32.mrf.mxu0  ;;  %v4685_v17 = vpop.f32.mrf.mxu1 }
 0x205   : > { %v4688_v24 = vadd.f32 %v3333_v60, %v4574_v48  ;;  %v2518_v48 = vsub.s32 0, %v2517_v53  ;;  %v2236_v32 = vadd.f32 %v3367_v35, %v4517_v23  ;;  %v3379_v23 = vadd.f32 %v4641_v34, %v4636_v8 }
 0x206   : > { %v3335_v13 = vpop.f32.mrf.mxu0  ;;  %v4690_v63 = vpop.f32.mrf.mxu1  ;;  %v3382_v8 = vadd.f32 %v4648_v33, %v4643_v3 }
 0x207   : > { %4996 = vst [vmem:[#allocation24_spill] sm:$0xff] %v4688_v24  ;;  %v3336_v46 = vadd.f32 %v3335_v13, %v3334_v58  ;;  %v3361_v58 = vadd.f32 %v4599_v61, %v4591_v50 }
 0x208   : > { %v3337_v12 = vpop.f32.mrf.mxu0  ;;  %v4692_v28 = vpop.f32.mrf.mxu1 }
 0x209   : > { %v4695_v37 = vadd.f32 %v3336_v46, %v4580_v0  ;;  %v2554_v0 = vsub.s32 1, %v2517_v53  ;;  %v3364_v53 = vadd.f32 %v4606_v21, %v4601_v36 }
 0x20a   : > { %v3338_v56 = vpop.f32.mrf.mxu0  ;;  %v4697_v29 = vpop.f32.mrf.mxu1 }
 0x20b   : > { %4997 = vst [vmem:[#allocation25_spill] sm:$0xff] %v4695_v37  ;;  %v3339_v11 = vadd.f32 %v3338_v56, %v3337_v12  ;;  %v4713_v56 = vrot.slane %v2515_v20, %v2518_v48  ;;  %v4720_v61 = vrot.slane %v2515_v20, %v2554_v0 }
 0x20c   : > { %v3340_v60 = vpop.f32.mrf.mxu0  ;;  %v4701_v24 = vpop.f32.mrf.mxu1 }
 0x20d   : > { %v4706_v26 = vadd.f32 %v3339_v11, %v4586_v14  ;;  %v2228_v11 = vadd.f32 %v3361_v58, %v4505_v54  ;;  %v3373_v54 = vadd.f32 %v4627_v19, %v4622_v41  ;;  %v2231_v58 = vadd.f32 %v3364_v53, %v4511_v10 }
 0x20e   : > { %v3341_v13 = vpop.f32.mrf.mxu0  ;;  %v4708_v46 = vpop.f32.mrf.mxu1  ;;  %v2252_v41 = vadd.f32 %v3379_v23, %v4541_v16  ;;  %v2255_v23 = vadd.f32 %v3382_v8, %v4547_v2 }
 0x20f   : > { %v3342_v12 = vadd.f32 %v3341_v13, %v3340_v60 }
 0x210   : > { %v4715_v37 = vpop.f32.mrf.mxu1  ;;  %v3497_v59 = vpop.f32.mrf.mxu0 }
 0x211   : > { %v4718_v50 = vadd.f32 %v3342_v12, %v4594_v25  ;;  %v2397_v14 = vadd.f32 %v3497_v59, %v2236_v32  ;;  %v2239_v25 = vadd.f32 %v3370_v45, %v4523_v52 }
 0x212   : > { %v4725_v31 = vpop.f32.mrf.mxu1  ;;  %v2388_v38 = vpop.f32.mrf.mxu0 }
 0x213   : > { %v2522_v35 = vmul.f32 %v4713_v56, %v2397_v14  ;;  %v2389_v48 = vadd.f32 %v2388_v38, %v2228_v11  ;;  %v2244_v14 = vadd.f32 %v3373_v54, %v4529_v18  ;;  %v3376_v11 = vadd.f32 %v4634_v62, %v4629_v57 }
 0x214   : > { %v4732_v59 = vpop.f32.mrf.mxu1  ;;  %v3498_v20 = vpop.f32.mrf.mxu0  ;;  %v3385_v62 = vadd.f32 %v4655_v47, %v4650_v43 }
 0x215   : > { %v2558_v36 = vadd.f32 %v4720_v61, %v2522_v35  ;;  %v2520_v21 = vmul.f32 %v4713_v56, %v2389_v48  ;;  %v2400_v60 = vadd.f32 %v3498_v20, %v2239_v25  ;;  %v3391_v35 = vadd.f32 %v4669_v30, %v4664_v22 }
 0x216   : > { %v4740_v34 = vpop.f32.mrf.mxu1  ;;  %v2391_v0 = vpop.f32.mrf.mxu0  ;;  %v2247_v8 = vadd.f32 %v3376_v11, %v4535_v9  ;;  %v2260_v9 = vadd.f32 %v3385_v62, %v4553_v42 }
 0x217   : > { %v2590_v52 = vmax.f32 %v2558_v36, 0.0  ;;  %v2556_v13 = vadd.f32 %v4720_v61, %v2520_v21  ;;  %v2523_v45 = vmul.f32 %v4713_v56, %v2400_v60  ;;  %v2392_v19 = vadd.f32 %v2391_v0, %v2231_v58 }
 0x218   : > { %v4746_v12 = vpop.f32.mrf.mxu1  ;;  %v3501_v32 = vpop.f32.mrf.mxu0  ;;  %v3394_v36 = vadd.f32 %v4676_v39, %v4671_v7  ;;  %v2268_v47 = vadd.f32 %v3391_v35, %v4565_v6  ;;  %v3406_v35 = vadd.f32 %v4708_v46, %v4701_v24 }
 0x219   : > { %2622 = vst [vmem:[%s4748_s22 + $0x10] sm:$0xff] %v2590_v52  ;;  %v2588_v3 = vmax.f32 %v2556_v13, 0.0  ;;  %v2559_v10 = vadd.f32 %v4720_v61, %v2523_v45  ;;  %v2413_v33 = vadd.f32 %v3501_v32, %v2252_v41  ;;  %v2521_v16 = vmul.f32 %v4713_v56, %v2392_v19 }
 0x21a   : > { %v4756_v53 = vpop.f32.mrf.mxu1  ;;  %v2404_v38 = vpop.f32.mrf.mxu0  ;;  %v3388_v32 = vadd.f32 %v4662_v4, %v4657_v51  ;;  %v3397_v4 = vadd.f32 %v4683_v49, %v4678_v27 }
 0x21b   : > { %2620 = vst [vmem:[%s4748_s22] sm:$0xff] %v2588_v3  ;;  %v2591_v48 = vmax.f32 %v2559_v10, 0.0  ;;  %v2526_v25 = vmul.f32 %v4713_v56, %v2413_v33  ;;  %v2405_v20 = vadd.f32 %v2404_v38, %v2244_v14  ;;  %v2557_v18 = vadd.f32 %v4720_v61, %v2521_v16 }
 0x21c   : > { %v4764_v54 = vpop.f32.mrf.mxu1  ;;  %v3502_v57 = vpop.f32.mrf.mxu0  ;;  %v2271_v33 = vadd.f32 %v3394_v36, %v4571_v15  ;;  %v3403_v14 = vadd.f32 %v4697_v29, %v4692_v28 }
 0x21d   : > { %2623 = vst [vmem:[%s4748_s22 + $0x18] sm:$0xff] %v2591_v48  ;;  %v2562_v2 = vadd.f32 %v4720_v61, %v2526_v25  ;;  %v2524_v22 = vmul.f32 %v4713_v56, %v2405_v20  ;;  %v2416_v30 = vadd.f32 %v3502_v57, %v2255_v23  ;;  %v2589_v21 = vmax.f32 %v2557_v18, 0.0 }
 0x21e   : > { %v4773_v60 = vpop.f32.mrf.mxu1  ;;  %v2407_v58 = vpop.f32.mrf.mxu0  ;;  %v2263_v20 = vadd.f32 %v3388_v32, %v4559_v55  ;;  %v2284_v49 = vadd.f32 %v3403_v14, %v4589_v1  ;;  %v2276_v55 = vadd.f32 %v3397_v4, %v4577_v44 }
 0x21f   : > { %v2594_v0 = vmax.f32 %v2562_v2, 0.0  ;;  %v2560_v52 = vadd.f32 %v4720_v61, %v2524_v22  ;;  %v2527_v43 = vmul.f32 %v4713_v56, %v2416_v30  ;;  %2621 = vst [vmem:[%s4748_s22 + $0x8] sm:$0xff] %v2589_v21  ;;  %v2408_v13 = vadd.f32 %v2407_v58, %v2247_v8 }
 0x220   : > { %v4780_v45 = vpop.f32.mrf.mxu1  ;;  %v3505_v41 = vpop.f32.mrf.mxu0  ;;  %v3400_v21 = vadd.f32 %v4690_v63, %v4685_v17  ;;  %v3409_v17 = vadd.f32 %v4725_v31, %v4715_v37  ;;  %v4998_v31 = vld [vmem:[#allocation14_spill] sm:$0xff] }
 0x221   : > { %2626 = vst [vmem:[%s4748_s22 + $0x30] sm:$0xff] %v2594_v0  ;;  %v2592_v7 = vmax.f32 %v2560_v52, 0.0  ;;  %v2563_v39 = vadd.f32 %v4720_v61, %v2527_v43  ;;  %v2429_v19 = vadd.f32 %v3505_v41, %v2268_v47  ;;  %v2525_v3 = vmul.f32 %v4713_v56, %v2408_v13 }
 0x222   : > { %v4788_v6 = vpop.f32.mrf.mxu1  ;;  %v2420_v10 = vpop.f32.mrf.mxu0  ;;  %v2287_v0 = vadd.f32 %v3406_v35, %v4597_v5  ;;  %v3415_v52 = vadd.f32 %v4756_v53, %v4746_v12  ;;  %v3418_v53 = vadd.f32 %v4773_v60, %v4764_v54 }
 0x223   : > { %2624 = vst [vmem:[%s4748_s22 + $0x20] sm:$0xff] %v2592_v7  ;;  %v2595_v11 = vmax.f32 %v2563_v39, 0.0  ;;  %v2530_v16 = vmul.f32 %v4713_v56, %v2429_v19  ;;  %v2421_v38 = vadd.f32 %v2420_v10, %v2260_v9  ;;  %v2561_v42 = vadd.f32 %v4720_v61, %v2525_v3 }
 0x224   : > { %v4796_v23 = vpop.f32.mrf.mxu1  ;;  %v3506_v51 = vpop.f32.mrf.mxu0  ;;  %v2279_v9 = vadd.f32 %v3400_v21, %v4583_v40 }
 0x225   : > { %2627 = vst [vmem:[%s4748_s22 + $0x38] sm:$0xff] %v2595_v11  ;;  %v2566_v15 = vadd.f32 %v4720_v61, %v2530_v16  ;;  %v2528_v28 = vmul.f32 %v4713_v56, %v2421_v38  ;;  %v2432_v29 = vadd.f32 %v3506_v51, %v2271_v33  ;;  %v2593_v48 = vmax.f32 %v2561_v42, 0.0  ;;  %v4999_v42 = vld [vmem:[#allocation12_spill] sm:$0xff] }
 0x226   : > { %v4805_v25 = vpop.f32.mrf.mxu1  ;;  %v2423_v18 = vpop.f32.mrf.mxu0  ;;  %v2300_v33 = vadd.f32 %v3415_v52, %v4998_v31  ;;  %v2292_v40 = vadd.f32 %v3409_v17, %v4999_v42  ;;  %v3412_v51 = vadd.f32 %v4740_v34, %v4732_v59  ;;  %v3421_v59 = vadd.f32 %v4788_v6, %v4780_v45 }
 0x227   : > { %v2598_v57 = vmax.f32 %v2566_v15, 0.0  ;;  %v2564_v62 = vadd.f32 %v4720_v61, %v2528_v28  ;;  %v2531_v27 = vmul.f32 %v4713_v56, %v2432_v29  ;;  %2625 = vst [vmem:[%s4748_s22 + $0x28] sm:$0xff] %v2593_v48  ;;  %v2424_v2 = vadd.f32 %v2423_v18, %v2263_v20  ;;  %v5000_v29 = vld [vmem:[#allocation15_spill] sm:$0xff] }
 0x228   : > { %v3425_v22 = vpop.f32.mrf.mxu1  ;;  %v3509_v30 = vpop.f32.mrf.mxu0  ;;  %v2303_v35 = vadd.f32 %v3418_v53, %v5000_v29  ;;  %v3424_v17 = vadd.f32 %v4805_v25, %v4796_v23  ;;  %v5004_v53 = vld [vmem:[#allocation19_spill] sm:$0xff] }
 0x229   : > { %2630 = vst [vmem:[%s4748_s22 + $0x50] sm:$0xff] %v2598_v57  ;;  %v2596_v24 = vmax.f32 %v2564_v62, 0.0  ;;  %v2567_v46 = vadd.f32 %v4720_v61, %v2531_v27  ;;  %v2445_v36 = vadd.f32 %v3509_v30, %v2284_v49  ;;  %v2529_v8 = vmul.f32 %v4713_v56, %v2424_v2 }
 0x22a   : > { %v3426_v58 = vpop.f32.mrf.mxu1  ;;  %v2436_v1 = vpop.f32.mrf.mxu0 }
 0x22b   : > { %2628 = vst [vmem:[%s4748_s22 + $0x40] sm:$0xff] %v2596_v24  ;;  %v2599_v43 = vmax.f32 %v2567_v46, 0.0  ;;  %v2534_v47 = vmul.f32 %v4713_v56, %v2445_v36  ;;  %v2437_v13 = vadd.f32 %v2436_v1, %v2276_v55  ;;  %v2565_v41 = vadd.f32 %v4720_v61, %v2529_v8  ;;  %v5001_v36 = vld [vmem:[#allocation13_spill] sm:$0xff] }
 0x22c   : > { %v3428_v44 = vpop.f32.mrf.mxu1  ;;  %v3510_v7 = vpop.f32.mrf.mxu0  ;;  %v3427_v48 = vadd.f32 %v3426_v58, %v3425_v22  ;;  %v2295_v55 = vadd.f32 %v3412_v51, %v5001_v36 }
 0x22d   : > { %2631 = vst [vmem:[%s4748_s22 + $0x58] sm:$0xff] %v2599_v43  ;;  %v2570_v63 = vadd.f32 %v4720_v61, %v2534_v47  ;;  %v2532_v5 = vmul.f32 %v4713_v56, %v2437_v13  ;;  %v2448_v12 = vadd.f32 %v3510_v7, %v2287_v0  ;;  %v2597_v39 = vmax.f32 %v2565_v41, 0.0  ;;  %v5002_v0 = vld [vmem:[#allocation18_spill] sm:$0xff] }
 0x22e   : > { %v3429_v19 = vpop.f32.mrf.mxu1  ;;  %v2439_v32 = vpop.f32.mrf.mxu0  ;;  %v2316_v45 = vadd.f32 %v3427_v48, %v5002_v0 }
 0x22f   : > { %v2602_v3 = vmax.f32 %v2570_v63, 0.0  ;;  %v2568_v10 = vadd.f32 %v4720_v61, %v2532_v5  ;;  %v2535_v37 = vmul.f32 %v4713_v56, %v2448_v12  ;;  %2629 = vst [vmem:[%s4748_s22 + $0x48] sm:$0xff] %v2597_v39  ;;  %v2440_v14 = vadd.f32 %v2439_v32, %v2279_v9 }
 0x230   : > { %v3431_v11 = vpop.f32.mrf.mxu1  ;;  %v3513_v16 = vpop.f32.mrf.mxu0  ;;  %v3430_v30 = vadd.f32 %v3429_v19, %v3428_v44  ;;  %v5003_v44 = vld [vmem:[#allocation16_spill] sm:$0xff] }
 0x231   : > { %2634 = vst [vmem:[%s4748_s22 + $0x70] sm:$0xff] %v2602_v3  ;;  %v2600_v38 = vmax.f32 %v2568_v10, 0.0  ;;  %v2571_v54 = vadd.f32 %v4720_v61, %v2535_v37  ;;  %v2461_v60 = vadd.f32 %v3513_v16, %v2300_v33  ;;  %v2533_v4 = vmul.f32 %v4713_v56, %v2440_v14 }
 0x232   : > { %v3432_v15 = vpop.f32.mrf.mxu1  ;;  %v2452_v28 = vpop.f32.mrf.mxu0  ;;  %v2308_v7 = vadd.f32 %v3421_v59, %v5003_v44  ;;  %v2319_v39 = vadd.f32 %v3430_v30, %v5004_v53 }
 0x233   : > { %2632 = vst [vmem:[%s4748_s22 + $0x60] sm:$0xff] %v2600_v38  ;;  %v2603_v20 = vmax.f32 %v2571_v54, 0.0  ;;  %v2538_v18 = vmul.f32 %v4713_v56, %v2461_v60  ;;  %v2453_v57 = vadd.f32 %v2452_v28, %v2292_v40  ;;  %v2569_v62 = vadd.f32 %v4720_v61, %v2533_v4  ;;  %v5005_v54 = vld [vmem:[#allocation17_spill] sm:$0xff]  ;;  %v5006_v40 = vld [vmem:[#allocation22_spill] sm:$0xff] }
 0x234   : > { %v3434_v27 = vpop.f32.mrf.mxu1  ;;  %v3514_v49 = vpop.f32.mrf.mxu0  ;;  %v3433_v33 = vadd.f32 %v3432_v15, %v3431_v11  ;;  %v2311_v60 = vadd.f32 %v3424_v17, %v5005_v54  ;;  %v5011_v54 = vld [vmem:[#allocation25_spill] sm:$0xff] }
 0x235   : > { %2635 = vst [vmem:[%s4748_s22 + $0x78] sm:$0xff] %v2603_v20  ;;  %v2574_v34 = vadd.f32 %v4720_v61, %v2538_v18  ;;  %v2536_v2 = vmul.f32 %v4713_v56, %v2453_v57  ;;  %v2464_v22 = vadd.f32 %v3514_v49, %v2303_v35  ;;  %v2601_v24 = vmax.f32 %v2569_v62, 0.0  ;;  %v5007_v62 = vld [vmem:[#allocation20_spill] sm:$0xff] }
 0x236   : > { %v3435_v46 = vpop.f32.mrf.mxu1  ;;  %v2455_v21 = vpop.f32.mrf.mxu0  ;;  %v2324_v49 = vadd.f32 %v3433_v33, %v5007_v62 }
 0x237   : > { %v2606_v8 = vmax.f32 %v2574_v34, 0.0  ;;  %v2572_v58 = vadd.f32 %v4720_v61, %v2536_v2  ;;  %v2539_v1 = vmul.f32 %v4713_v56, %v2464_v22  ;;  %2633 = vst [vmem:[%s4748_s22 + $0x68] sm:$0xff] %v2601_v24  ;;  %v2456_v6 = vadd.f32 %v2455_v21, %v2295_v55  ;;  %v5008_v55 = vld [vmem:[#allocation23_spill] sm:$0xff] }
 0x238   : > { %v3437_v52 = vpop.f32.mrf.mxu1  ;;  %v3517_v43 = vpop.f32.mrf.mxu0  ;;  %v3436_v59 = vadd.f32 %v3435_v46, %v3434_v27 }
 0x239   : > { %2638 = vst [vmem:[%s4748_s22 + $0x90] sm:$0xff] %v2606_v8  ;;  %v2604_v47 = vmax.f32 %v2572_v58, 0.0  ;;  %v2575_v13 = vadd.f32 %v4720_v61, %v2539_v1  ;;  %v2477_v41 = vadd.f32 %v3517_v43, %v2316_v45  ;;  %v2537_v63 = vmul.f32 %v4713_v56, %v2456_v6  ;;  %v5009_v43 = vld [vmem:[#allocation21_spill] sm:$0xff] }
 0x23a   : > { %v3438_v5 = vpop.f32.mrf.mxu1  ;;  %v2468_v12 = vpop.f32.mrf.mxu0 }
 0x23b   : > { %2636 = vst [vmem:[%s4748_s22 + $0x80] sm:$0xff] %v2604_v47  ;;  %v2607_v19 = vmax.f32 %v2575_v13, 0.0  ;;  %v2542_v9 = vmul.f32 %v4713_v56, %v2477_v41  ;;  %v3439_v32 = vadd.f32 %v3438_v5, %v3437_v52  ;;  %v2469_v3 = vadd.f32 %v2468_v12, %v2308_v7 }
 0x23c   : > { %v2573_v10 = vadd.f32 %v4720_v61, %v2537_v63  ;;  %v3440_v37 = vpop.f32.mrf.mxu1  ;;  %v3518_v31 = vpop.f32.mrf.mxu0  ;;  %v2327_v47 = vadd.f32 %v3436_v59, %v5009_v43 }
 0x23d   : > { %2639 = vst [vmem:[%s4748_s22 + $0x98] sm:$0xff] %v2607_v19  ;;  %v2578_v23 = vadd.f32 %v4720_v61, %v2542_v9  ;;  %v2540_v25 = vmul.f32 %v4713_v56, %v2469_v3  ;;  %v2480_v14 = vadd.f32 %v3518_v31, %v2319_v39  ;;  %v2332_v51 = vadd.f32 %v3439_v32, %v5006_v40  ;;  %v5010_v19 = vld [vmem:[#allocation24_spill] sm:$0xff] }
 0x23e   : > { %v2605_v16 = vmax.f32 %v2573_v10, 0.0  ;;  %v3441_v38 = vpop.f32.mrf.mxu1  ;;  %v2471_v42 = vpop.f32.mrf.mxu0 }
 0x23f   : > { %v2610_v4 = vmax.f32 %v2578_v23, 0.0  ;;  %v2576_v28 = vadd.f32 %v4720_v61, %v2540_v25  ;;  %v2543_v11 = vmul.f32 %v4713_v56, %v2480_v14  ;;  %v3442_v15 = vadd.f32 %v3441_v38, %v3440_v37 }
 0x240   : > { %2637 = vst [vmem:[%s4748_s22 + $0x88] sm:$0xff] %v2605_v16  ;;  %v2472_v29 = vadd.f32 %v2471_v42, %v2311_v60  ;;  %v3443_v35 = vpop.f32.mrf.mxu1  ;;  %v3521_v48 = vpop.f32.mrf.mxu0 }
 0x241   : > { %2642 = vst [vmem:[%s4748_s22 + $0xb0] sm:$0xff] %v2610_v4  ;;  %v2608_v20 = vmax.f32 %v2576_v28, 0.0  ;;  %v2579_v18 = vadd.f32 %v4720_v61, %v2543_v11  ;;  %v2493_v57 = vadd.f32 %v3521_v48, %v2332_v51  ;;  %v2335_v21 = vadd.f32 %v3442_v15, %v5008_v55 }
 0x242   : > { %v2541_v34 = vmul.f32 %v4713_v56, %v2472_v29  ;;  %v3444_v2 = vpop.f32.mrf.mxu1  ;;  %v2484_v22 = vpop.f32.mrf.mxu0 }
 0x243   : > { %2640 = vst [vmem:[%s4748_s22 + $0xa0] sm:$0xff] %v2608_v20  ;;  %v2611_v30 = vmax.f32 %v2579_v18, 0.0  ;;  %v2546_v24 = vmul.f32 %v4713_v56, %v2493_v57  ;;  %v2485_v36 = vadd.f32 %v2484_v22, %v2324_v49  ;;  %v3445_v46 = vadd.f32 %v3444_v2, %v3443_v35 }
 0x244   : > { %v2577_v8 = vadd.f32 %v4720_v61, %v2541_v34  ;;  %v3446_v58 = vpop.f32.mrf.mxu1  ;;  %v3522_v1 = vpop.f32.mrf.mxu0 }
 0x245   : > { %2643 = vst [vmem:[%s4748_s22 + $0xb8] sm:$0xff] %v2611_v30  ;;  %v2582_v27 = vadd.f32 %v4720_v61, %v2546_v24  ;;  %v2544_v0 = vmul.f32 %v4713_v56, %v2485_v36  ;;  %v2496_v45 = vadd.f32 %v3522_v1, %v2335_v21  ;;  %v2340_v9 = vadd.f32 %v3445_v46, %v5010_v19 }
 0x246   : > { %v2609_v6 = vmax.f32 %v2577_v8, 0.0  ;;  %v3447_v52 = vpop.f32.mrf.mxu1  ;;  %v2487_v13 = vpop.f32.mrf.mxu0 }
 0x247   : > { %v2614_v41 = vmax.f32 %v2582_v27, 0.0  ;;  %v2580_v44 = vadd.f32 %v4720_v61, %v2544_v0  ;;  %v2547_v7 = vmul.f32 %v4713_v56, %v2496_v45  ;;  %v2488_v17 = vadd.f32 %v2487_v13, %v2327_v47 }
 0x248   : > { %2641 = vst [vmem:[%s4748_s22 + $0xa8] sm:$0xff] %v2609_v6  ;;  %v3449_v63 = vpop.f32.mrf.mxu1  ;;  %v3525_v5 = vpop.f32.mrf.mxu0  ;;  %v3448_v39 = vadd.f32 %v3447_v52, %v3446_v58 }
 0x249   : > { %2646 = vst [vmem:[%s4748_s22 + $0xd0] sm:$0xff] %v2614_v41  ;;  %v2612_v12 = vmax.f32 %v2580_v44, 0.0  ;;  %v2583_v53 = vadd.f32 %v4720_v61, %v2547_v7  ;;  %v2545_v32 = vmul.f32 %v4713_v56, %v2488_v17 }
 0x24a   : > { %v3450_v3 = vpop.f32.mrf.mxu1  ;;  %v2500_v10 = vpop.f32.mrf.mxu0  ;;  %v2343_v60 = vadd.f32 %v3448_v39, %v5011_v54 }
 0x24b   : > { %2644 = vst [vmem:[%s4748_s22 + $0xc0] sm:$0xff] %v2612_v12  ;;  %v2615_v37 = vmax.f32 %v2583_v53, 0.0  ;;  %v3451_v31 = vadd.f32 %v3450_v3, %v3449_v63  ;;  %v2501_v33 = vadd.f32 %v2500_v10, %v2340_v9  ;;  %v2581_v23 = vadd.f32 %v4720_v61, %v2545_v32 }
 0x24c   : > { %v3452_v25 = vpop.f32.mrf.mxu1  ;;  %v3526_v14 = vpop.f32.mrf.mxu0 }
 0x24d   : > { %2647 = vst [vmem:[%s4748_s22 + $0xd8] sm:$0xff] %v2615_v37  ;;  %v2348_v16 = vadd.f32 %v3451_v31, %v4706_v26  ;;  %v2548_v38 = vmul.f32 %v4713_v56, %v2501_v33  ;;  %v2613_v42 = vmax.f32 %v2581_v23, 0.0 }
 0x24e   : > { %v3453_v40 = vpop.f32.mrf.mxu1  ;;  %v2503_v51 = vpop.f32.mrf.mxu0 }
 0x24f   : > { %v2509_v4 = vadd.f32 %v3525_v5, %v2348_v16  ;;  %v2584_v28 = vadd.f32 %v4720_v61, %v2548_v38  ;;  %v3454_v11 = vadd.f32 %v3453_v40, %v3452_v25  ;;  %v2504_v15 = vadd.f32 %v2503_v51, %v2343_v60  ;;  %2645 = vst [vmem:[%s4748_s22 + $0xc8] sm:$0xff] %v2613_v42 }
 0x251   : > { %v2550_v26 = vmul.f32 %v4713_v56, %v2509_v4  ;;  %v2616_v29 = vmax.f32 %v2584_v28, 0.0  ;;  %v2351_v35 = vadd.f32 %v3454_v11, %v4718_v50  ;;  %v2549_v48 = vmul.f32 %v4713_v56, %v2504_v15 }
 0x253   : > { %v2586_v20 = vadd.f32 %v4720_v61, %v2550_v26  ;;  %2648 = vst [vmem:[%s4748_s22 + $0xe0] sm:$0xff] %v2616_v29  ;;  %v2512_v18 = vadd.f32 %v3526_v14, %v2351_v35  ;;  %v2585_v57 = vadd.f32 %v4720_v61, %v2549_v48 }
 0x255   : > { %v2618_v62 = vmax.f32 %v2586_v20, 0.0  ;;  %v2551_v49 = vmul.f32 %v4713_v56, %v2512_v18  ;;  %v2617_v59 = vmax.f32 %v2585_v57, 0.0 }
 0x257   : > { %2650 = vst [vmem:[%s4748_s22 + $0xf0] sm:$0xff] %v2618_v62  ;;  %v2587_v50 = vadd.f32 %v4720_v61, %v2551_v49  ;;  %2649 = vst [vmem:[%s4748_s22 + $0xe8] sm:$0xff] %v2617_v59 }
 0x259   : > { %v2619_v34 = vmax.f32 %v2587_v50, 0.0 }
 0x25b   : > { %2651 = vst [vmem:[%s4748_s22 + $0xf8] sm:$0xff] %v2619_v34 }
 0x25c   : > { %4008 = shalt.err (!%p4005_p5)
}
 0x25d   : > { %s4009_s27 = scalar_lea.hbm %s4916_s8, 4096  ;;  %s4013_s6 = scalar_lea.hbm %s4970_s3, 8192 }
 0x25e   : > { %p4010_p10 = scmp.ne.s32.totalorder %s4916_s8, %s4009_s27  ;;  %p4014_p6 = scmp.lt.s32.totalorder %s4916_s8, %s4970_s3 }
 0x25f   : > { %p4015_p12 = scmp.lt.s32.totalorder %s4013_s6, %s4009_s27 }
 0x260   : > { %p4011_p1 = pnand %p4010_p10, %p4206_p7 }
 0x261   : > { %p4016_p3 = por %p4015_p12, %p4014_p6 }
 0x262   : > { %p4012_p4 = pneg %p4011_p1 }
 0x264   : > { %p4017_p8 = pnand %p4016_p3, %p4012_p4 }
 0x266   : > { %4020 = shalt.err (!%p4017_p8)
}
 0x267   : > { %s4089_s22 = smov 128   ;;  %s4090_s24 = smov 8  }
 0x268   : > { %3556 = dma.vmem_to_hbm [thread:$0]  (%p4206_p7), %s4918_s28, 4096, %s4916_s8, %s2653_s9, %s4089_s22, %s4089_s22, %s4090_s24  }
 0x269 PF: > { %s2683_s5 = sand.u32 1, %s4059_s12   ;;  %p5012_p9 = scmp.ne.s32.totalorder %s4977_s23, 0 }
 0x26a   : > { %p5013_p11 = scmp.ge.s32.totalorder %s4079_s17, 2  ;;  %s2684_s7 = scalar_lea.sflag [#allocation4], %s2683_s5 }
 0x26c   : > { %p3570_p2 = pnand %p5013_p11, %p5012_p9 }
 0x26e   : > { %p3571_p13 = pneg %p3570_p2 }
 0x270   : > { %4054 = dma.done.wait (%p3571_p13), %s2684_s7, 4096  }
 0x271   : > { %4056 = vsyncadd (%p3571_p13), %s2684_s7, 4294963200  ;;  %s20_s17 = sadd.s32 1, %s4079_s17   ;;  %s5014_s12 = smov %s4063_s13 }
 0x272   : > { %p17_p0 = scmp.ge.s32.totalorder %s20_s17, 4   ;;  %s5015_s13 = smov %s4067_s14 }
 0x273   : > { %s5016_s14 = smov %s4218_s29  ;;  %s5017_s15 = smov %s4075_s16 }
 0x274   : > { %s5018_s16 = smov %s5020_s11  ;;  %19 = sbr.rel (!%p17_p0) target bundleno = 7 (0x7), region = 85 }
 0x279   :  { %2689 = vsyncpa [#allocation3], 1 }
 0x27a   :  { %2691 = vsyncpa [#allocation3 + $0x1], 1 }
 0x27b   :  { %2692 = vsyncpa [#allocation6], 1 }
 0x27c   :  { %2693 = vsyncpa [#allocation4], 1 }
 0x27d   :  { %2695 = vsyncpa [#allocation4 + $0x1], 1 }

</bundles_post_ra>
